<compile_context>
chip_gen: v7x
topology: tpu7x:2x2x1
jax: 0.10.0
libtpu: 0.0.40
codegen_flags: <defaults>
</compile_context>

<pallas_src>
import jax
import jax.numpy as jnp
from jax.experimental import pallas as pl
from jax.experimental.pallas import tpu as pltpu

# Static geometry for input_shape = (4, 16, 16).
C_IN, H_IN, W_IN = 4, 16, 16
K = 3                      # conv kernel size (all layers)
H1, W1 = 7, 7              # after Conv(4->8,  k3, stride 2) on 16x16
H2, W2 = 5, 5              # after Conv(16->8, k3, stride 1)
H3, W3 = 3, 3              # after Conv(16->8, k3, stride 1)
CC = 16                    # channels after each cReLU (2 * 8)
FC_HIDDEN = 32
FEAT = CC * H3 * W3        # 144
OUT_PAD = 128              # lane-dense padded width of the final output


# ---------------------------------------------------------------------------
# Fused kernel: conv1+cReLU -> conv2+cReLU -> conv3+cReLU -> fc head
# ---------------------------------------------------------------------------
def _dqn_fused_kernel(p1_ref, w1_ref, b1_ref, w2_ref, b2_ref, w3_ref, b3_ref,
                      wf1_ref, bf1_ref, wf2_ref, bf2_ref, o_ref):
    tb = o_ref.shape[0]                       # samples in this batch block

    # ---- conv1 (stride 2) + cReLU: one full-block matmul on the patches ----
    y1 = jnp.dot(p1_ref[...], w1_ref[...], preferred_element_type=jnp.float32)
    a1 = jnp.maximum(y1 + b1_ref[...], 0.0).astype(jnp.bfloat16)   # (tb*49, 16)
    a1 = a1.reshape(tb, H1, W1, CC)

    def conv_taps(a, w_ref, b_ref, h_out, w_out):
        # Stride-1 KxK conv + cReLU as K*K accumulated full-batch matmuls:
        #   acc += a[:, kh:kh+h_out, kw:kw+w_out, :] @ W[kh,kw]   (f32 acc)
        # No per-row im2col, no lane concats; weights already [W,-W] packed.
        n_, _, _, c = a.shape
        m = n_ * h_out * w_out
        acc = jnp.zeros((m, w_ref.shape[-1]), jnp.float32)
        for kh in range(K):
            for kw in range(K):
                src = a[:, kh:kh + h_out, kw:kw + w_out, :].reshape(m, c)
                acc = acc + jnp.dot(src, w_ref[kh * K + kw],
                                    preferred_element_type=jnp.float32)
        out = jnp.maximum(acc + b_ref[...], 0.0).astype(jnp.bfloat16)
        return out.reshape(n_, h_out, w_out, w_ref.shape[-1])

    a2 = conv_taps(a1, w2_ref, b2_ref, H2, W2)           # (tb, 5, 5, 16)
    a3 = conv_taps(a2, w3_ref, b3_ref, H3, W3)           # (tb, 3, 3, 16)
    a3 = a3.reshape(tb, H3 * W3, CC)                     # (tb, 9, 16)

    # ---- fc1 with the NCHW flatten folded into wf1: 9 accumulated dots ----
    h = jnp.zeros((tb, FC_HIDDEN), jnp.float32)
    for p in range(H3 * W3):
        h = h + jnp.dot(a3[:, p, :], wf1_ref[p],
                        preferred_element_type=jnp.float32)
    h = jnp.maximum(h + bf1_ref[...], 0.0).astype(jnp.bfloat16)

    # ---- fc2: output padded to 128 lanes -> unmasked stores ----
    o_ref[...] = jnp.dot(h, wf2_ref[...],
                         preferred_element_type=jnp.float32) + bf2_ref[...]


# ---------------------------------------------------------------------------
# One-time parameter packing (outside the per-step forward)
# ---------------------------------------------------------------------------
def pack_params(params):
    """Fold transposes, the [W,-W]/[b,-b] cReLU trick, the NCHW-flatten
    permutation, output-lane padding and bf16 casts into a one-time step."""
    def pack_conv_taps(w, b):
        o, c, kh, kw = w.shape
        # taps ordered (kh, kw); per-tap matrix is (c_in, out) with [W,-W]
        wt = jnp.transpose(w, (2, 3, 1, 0)).reshape(kh * kw, c, o)
        wp = jnp.concatenate([wt, -wt], axis=-1).astype(jnp.bfloat16)   # (9,c,2o)
        bp = jnp.concatenate([b, -b]).reshape(1, 2 * o).astype(jnp.float32)
        return wp, bp

    w1t, b1 = pack_conv_taps(params["w1"], params["b1"])
    # conv1 patches are precomputed as (kh, kw, c) columns -> flatten taps
    w1 = w1t.reshape(K * K * C_IN, CC)                                   # (36,16)
    w2, b2 = pack_conv_taps(params["w2"], params["b2"])                  # (9,16,16)
    w3, b3 = pack_conv_taps(params["w3"], params["b3"])                  # (9,16,16)

    # fc1: PyTorch flattens NCHW -> feature index c*9 + p. Pack as (p, c, 32)
    # so the kernel can contract conv3's (tb, 9, 16) output directly.
    wf1 = params["w_fc1"].reshape(FC_HIDDEN, CC, H3 * W3)
    wf1 = jnp.transpose(wf1, (2, 1, 0)).astype(jnp.bfloat16)             # (9,16,32)
    bf1 = params["b_fc1"].reshape(1, FC_HIDDEN).astype(jnp.float32)

    na = params["w_fc2"].shape[0]
    wf2 = jnp.pad(params["w_fc2"].T, ((0, 0), (0, OUT_PAD - na)))
    wf2 = wf2.astype(jnp.bfloat16)                                       # (32,128)
    bf2 = jnp.pad(params["b_fc2"], (0, OUT_PAD - na)).reshape(1, OUT_PAD)
    bf2 = bf2.astype(jnp.float32)

    return dict(w1=w1, b1=b1, w2=w2, b2=b2, w3=w3, b3=b3,
                wf1=wf1, bf1=bf1, wf2=wf2, bf2=bf2)


# ---------------------------------------------------------------------------
# Forward pass (NCHW input, like PyTorch)
# ---------------------------------------------------------------------------
def dqn_conv_forward(x_nchw, packed, *, num_actions, block_batch=64):
    n = x_nchw.shape[0]

    # Layer-1 im2col (stride 2) on the raw input; columns ordered (kh, kw, c).
    # Kept in XLA: it touches the raw input exactly once and avoids strided
    # slicing inside the kernel.
    x = jnp.transpose(x_nchw, (0, 2, 3, 1))                     # NCHW -> NHWC
    cols = [x[:, kh:kh + 2 * H1:2, kw:kw + 2 * W1:2, :]
            for kh in range(K) for kw in range(K)]
    p1 = jnp.concatenate(cols, axis=-1).reshape(n * H1 * W1, K * K * C_IN)
    p1 = p1.astype(jnp.bfloat16)

    # Batch tiling: one block for small batches, otherwise blocks of
    # `block_batch` (multiple of 8 so the (8,128) block rule holds) sharded
    # across TensorCores via the parallel grid axis.
    if n <= block_batch:
        tb, n_pad = n, n
    else:
        tb = block_batch
        n_pad = ((n + tb - 1) // tb) * tb
        p1 = jnp.pad(p1, ((0, (n_pad - n) * H1 * W1), (0, 0)))
    grid = (n_pad // tb,)

    args = (p1, packed["w1"], packed["b1"], packed["w2"], packed["b2"],
            packed["w3"], packed["b3"], packed["wf1"], packed["bf1"],
            packed["wf2"], packed["bf2"])

    in_specs = [
        pl.BlockSpec((tb * H1 * W1, K * K * C_IN), lambda i: (i, 0)),  # p1
        pl.BlockSpec((K * K * C_IN, CC), lambda i: (0, 0)),            # w1
        pl.BlockSpec((1, CC), lambda i: (0, 0)),                       # b1
        pl.BlockSpec((K * K, CC, CC), lambda i: (0, 0, 0)),            # w2
        pl.BlockSpec((1, CC), lambda i: (0, 0)),                       # b2
        pl.BlockSpec((K * K, CC, CC), lambda i: (0, 0, 0)),            # w3
        pl.BlockSpec((1, CC), lambda i: (0, 0)),                       # b3
        pl.BlockSpec((H3 * W3, CC, FC_HIDDEN), lambda i: (0, 0, 0)),   # wf1
        pl.BlockSpec((1, FC_HIDDEN), lambda i: (0, 0)),                # bf1
        pl.BlockSpec((FC_HIDDEN, OUT_PAD), lambda i: (0, 0)),          # wf2
        pl.BlockSpec((1, OUT_PAD), lambda i: (0, 0)),                  # bf2
    ]
    out_specs = pl.BlockSpec((tb, OUT_PAD), lambda i: (i, 0))

    flops = 2 * n_pad * (H1 * W1 * (K * K * C_IN) * CC
                         + H2 * W2 * (K * K * CC) * CC
                         + H3 * W3 * (K * K * CC) * CC
                         + FEAT * FC_HIDDEN + FC_HIDDEN * OUT_PAD)
    bytes_accessed = sum(int(a.size) * a.dtype.itemsize for a in args)
    bytes_accessed += n_pad * OUT_PAD * 4

    out = pl.pallas_call(
        _dqn_fused_kernel,
        grid=grid,
        in_specs=in_specs,
        out_specs=out_specs,
        out_shape=jax.ShapeDtypeStruct((n_pad, OUT_PAD), jnp.float32),
        compiler_params=pltpu.CompilerParams(
            dimension_semantics=("parallel",)),
        cost_estimate=pl.CostEstimate(flops=flops, transcendentals=0,
                                      bytes_accessed=bytes_accessed),
    )(*args)

    # Drop batch padding and the lane padding of the action dimension.
    return out[:n, :num_actions]


# ---------------------------------------------------------------------------
# Deterministic parameter construction (shapes from DQNConv.__init__)
# ---------------------------------------------------------------------------
def init_params(key, c_in, num_actions, feat_size):
    ks = jax.random.split(key, 10)
    s = 0.1
    return {
        "w1": s * jax.random.normal(ks[0], (8, c_in, 3, 3), jnp.float32),
        "b1": s * jax.random.normal(ks[1], (8,), jnp.float32),
        "w2": s * jax.random.normal(ks[2], (8, 16, 3, 3), jnp.float32),
        "b2": s * jax.random.normal(ks[3], (8,), jnp.float32),
        "w3": s * jax.random.normal(ks[4], (8, 16, 3, 3), jnp.float32),
        "b3": s * jax.random.normal(ks[5], (8,), jnp.float32),
        "w_fc1": s * jax.random.normal(ks[6], (32, feat_size), jnp.float32),
        "b_fc1": s * jax.random.normal(ks[7], (32,), jnp.float32),
        "w_fc2": s * jax.random.normal(ks[8], (num_actions, 32), jnp.float32),
        "b_fc2": s * jax.random.normal(ks[9], (num_actions,), jnp.float32),
    }


if __name__ == "__main__":
    key = jax.random.PRNGKey(0)
    k_x, k_p = jax.random.split(key)

    batch, num_actions = 2, 6
    x = jax.random.normal(k_x, (batch, C_IN, H_IN, W_IN), jnp.float32)  # NCHW
    params = init_params(k_p, C_IN, num_actions, FEAT)
    packed = pack_params(params)          # one-time weight packing

    fwd = jax.jit(dqn_conv_forward, static_argnames=("num_actions",
                                                     "block_batch"))
    q = jax.block_until_ready(fwd(x, packed, num_actions=num_actions))
    assert q.shape == (batch, num_actions), q.shape
    print("KERNEL_OK")
</pallas_src>

<mosaic_0001>
module attributes {stable_mosaic.version = 11 : i64} {
  func.func @_dqn_fused_kernel(%arg0: i32, %arg1: memref<98x36xbf16, #tpu.memory_space<vmem>>, %arg2: memref<36x16xbf16, #tpu.memory_space<vmem>>, %arg3: memref<1x16xf32, #tpu.memory_space<vmem>>, %arg4: memref<9x16x16xbf16, #tpu.memory_space<vmem>>, %arg5: memref<1x16xf32, #tpu.memory_space<vmem>>, %arg6: memref<9x16x16xbf16, #tpu.memory_space<vmem>>, %arg7: memref<1x16xf32, #tpu.memory_space<vmem>>, %arg8: memref<9x16x32xbf16, #tpu.memory_space<vmem>>, %arg9: memref<1x32xf32, #tpu.memory_space<vmem>>, %arg10: memref<32x128xbf16, #tpu.memory_space<vmem>>, %arg11: memref<1x128xf32, #tpu.memory_space<vmem>>, %arg12: memref<2x128xf32, #tpu.memory_space<vmem>>) attributes {dimension_semantics = [#tpu.dimension_semantics<parallel>], iteration_bounds = array<i64: 1>, scalar_prefetch = 0 : i64, scratch_operands = 0 : i64, tpu.core_type = #tpu.core_type<tc>, window_params = [{transform_indices = @transform_0, window_bounds = array<i64: 98, 36>}, {pipeline_mode = #tpu.pipeline_mode<synchronous>, transform_indices = @transform_1, window_bounds = array<i64: 36, 16>}, {pipeline_mode = #tpu.pipeline_mode<synchronous>, transform_indices = @transform_2, window_bounds = array<i64: 1, 16>}, {pipeline_mode = #tpu.pipeline_mode<synchronous>, transform_indices = @transform_3, window_bounds = array<i64: 9, 16, 16>}, {pipeline_mode = #tpu.pipeline_mode<synchronous>, transform_indices = @transform_4, window_bounds = array<i64: 1, 16>}, {pipeline_mode = #tpu.pipeline_mode<synchronous>, transform_indices = @transform_5, window_bounds = array<i64: 9, 16, 16>}, {pipeline_mode = #tpu.pipeline_mode<synchronous>, transform_indices = @transform_6, window_bounds = array<i64: 1, 16>}, {pipeline_mode = #tpu.pipeline_mode<synchronous>, transform_indices = @transform_7, window_bounds = array<i64: 9, 16, 32>}, {pipeline_mode = #tpu.pipeline_mode<synchronous>, transform_indices = @transform_8, window_bounds = array<i64: 1, 32>}, {pipeline_mode = #tpu.pipeline_mode<synchronous>, transform_indices = @transform_9, window_bounds = array<i64: 32, 128>}, {pipeline_mode = #tpu.pipeline_mode<synchronous>, transform_indices = @transform_10, window_bounds = array<i64: 1, 128>}, {transform_indices = @transform_11, window_bounds = array<i64: 2, 128>}]} {
    %c0 = arith.constant 0 : index
    %c0_0 = arith.constant 0 : index
    %0 = vector.load %arg1[%c0, %c0_0] : memref<98x36xbf16, #tpu.memory_space<vmem>>, vector<98x36xbf16>
    %c0_1 = arith.constant 0 : index
    %c0_2 = arith.constant 0 : index
    %1 = vector.load %arg2[%c0_1, %c0_2] : memref<36x16xbf16, #tpu.memory_space<vmem>>, vector<36x16xbf16>
    %cst = arith.constant dense<0.000000e+00> : vector<98x16xf32>
    %2 = tpu.matmul %0, %1, %cst {dimension_numbers = #tpu.dot_dimension_numbers<[1], [0], [0], [1], [0, 0, 1, 1], [], []>} : vector<98x36xbf16>, vector<36x16xbf16>, vector<98x16xf32> -> vector<98x16xf32>
    %c0_3 = arith.constant 0 : index
    %c0_4 = arith.constant 0 : index
    %3 = vector.load %arg3[%c0_3, %c0_4] : memref<1x16xf32, #tpu.memory_space<vmem>>, vector<1x16xf32>
    %4 = vector.broadcast %3 : vector<1x16xf32> to vector<98x16xf32>
    %5 = arith.addf %2, %4 : vector<98x16xf32>
    %cst_5 = arith.constant 0.000000e+00 : f32
    %6 = vector.broadcast %cst_5 : f32 to vector<98x16xf32>
    %7 = arith.maximumf %5, %6 : vector<98x16xf32>
    %8 = arith.truncf %7 : vector<98x16xf32> to vector<98x16xbf16>
    %9 = vector.shape_cast %8 : vector<98x16xbf16> to vector<2x7x7x16xbf16>
    %cst_6 = arith.constant 0.000000e+00 : f32
    %10 = vector.broadcast %cst_6 : f32 to vector<50x16xf32>
    %11 = vector.extract_strided_slice %9 {offsets = [0, 0, 0, 0], sizes = [2, 5, 5, 16], strides = [1, 1, 1, 1]} : vector<2x7x7x16xbf16> to vector<2x5x5x16xbf16>
    %12 = vector.shape_cast %11 : vector<2x5x5x16xbf16> to vector<50x16xbf16>
    %c0_7 = arith.constant 0 : index
    %c0_8 = arith.constant 0 : index
    %c0_9 = arith.constant 0 : index
    %13 = vector.load %arg4[%c0_7, %c0_8, %c0_9] : memref<9x16x16xbf16, #tpu.memory_space<vmem>>, vector<1x16x16xbf16>
    %14 = vector.shape_cast %13 : vector<1x16x16xbf16> to vector<16x16xbf16>
    %cst_10 = arith.constant dense<0.000000e+00> : vector<50x16xf32>
    %15 = tpu.matmul %12, %14, %cst_10 {dimension_numbers = #tpu.dot_dimension_numbers<[1], [0], [0], [1], [0, 0, 1, 1], [], []>} : vector<50x16xbf16>, vector<16x16xbf16>, vector<50x16xf32> -> vector<50x16xf32>
    %16 = arith.addf %10, %15 : vector<50x16xf32>
    %17 = vector.extract_strided_slice %9 {offsets = [0, 0, 1, 0], sizes = [2, 5, 5, 16], strides = [1, 1, 1, 1]} : vector<2x7x7x16xbf16> to vector<2x5x5x16xbf16>
    %18 = vector.shape_cast %17 : vector<2x5x5x16xbf16> to vector<50x16xbf16>
    %c1 = arith.constant 1 : index
    %c0_11 = arith.constant 0 : index
    %c0_12 = arith.constant 0 : index
    %19 = vector.load %arg4[%c1, %c0_11, %c0_12] : memref<9x16x16xbf16, #tpu.memory_space<vmem>>, vector<1x16x16xbf16>
    %20 = vector.shape_cast %19 : vector<1x16x16xbf16> to vector<16x16xbf16>
    %cst_13 = arith.constant dense<0.000000e+00> : vector<50x16xf32>
    %21 = tpu.matmul %18, %20, %cst_13 {dimension_numbers = #tpu.dot_dimension_numbers<[1], [0], [0], [1], [0, 0, 1, 1], [], []>} : vector<50x16xbf16>, vector<16x16xbf16>, vector<50x16xf32> -> vector<50x16xf32>
    %22 = arith.addf %16, %21 : vector<50x16xf32>
    %23 = vector.extract_strided_slice %9 {offsets = [0, 0, 2, 0], sizes = [2, 5, 5, 16], strides = [1, 1, 1, 1]} : vector<2x7x7x16xbf16> to vector<2x5x5x16xbf16>
    %24 = vector.shape_cast %23 : vector<2x5x5x16xbf16> to vector<50x16xbf16>
    %c2 = arith.constant 2 : index
    %c0_14 = arith.constant 0 : index
    %c0_15 = arith.constant 0 : index
    %25 = vector.load %arg4[%c2, %c0_14, %c0_15] : memref<9x16x16xbf16, #tpu.memory_space<vmem>>, vector<1x16x16xbf16>
    %26 = vector.shape_cast %25 : vector<1x16x16xbf16> to vector<16x16xbf16>
    %cst_16 = arith.constant dense<0.000000e+00> : vector<50x16xf32>
    %27 = tpu.matmul %24, %26, %cst_16 {dimension_numbers = #tpu.dot_dimension_numbers<[1], [0], [0], [1], [0, 0, 1, 1], [], []>} : vector<50x16xbf16>, vector<16x16xbf16>, vector<50x16xf32> -> vector<50x16xf32>
    %28 = arith.addf %22, %27 : vector<50x16xf32>
    %29 = vector.extract_strided_slice %9 {offsets = [0, 1, 0, 0], sizes = [2, 5, 5, 16], strides = [1, 1, 1, 1]} : vector<2x7x7x16xbf16> to vector<2x5x5x16xbf16>
    %30 = vector.shape_cast %29 : vector<2x5x5x16xbf16> to vector<50x16xbf16>
    %c3 = arith.constant 3 : index
    %c0_17 = arith.constant 0 : index
    %c0_18 = arith.constant 0 : index
    %31 = vector.load %arg4[%c3, %c0_17, %c0_18] : memref<9x16x16xbf16, #tpu.memory_space<vmem>>, vector<1x16x16xbf16>
    %32 = vector.shape_cast %31 : vector<1x16x16xbf16> to vector<16x16xbf16>
    %cst_19 = arith.constant dense<0.000000e+00> : vector<50x16xf32>
    %33 = tpu.matmul %30, %32, %cst_19 {dimension_numbers = #tpu.dot_dimension_numbers<[1], [0], [0], [1], [0, 0, 1, 1], [], []>} : vector<50x16xbf16>, vector<16x16xbf16>, vector<50x16xf32> -> vector<50x16xf32>
    %34 = arith.addf %28, %33 : vector<50x16xf32>
    %35 = vector.extract_strided_slice %9 {offsets = [0, 1, 1, 0], sizes = [2, 5, 5, 16], strides = [1, 1, 1, 1]} : vector<2x7x7x16xbf16> to vector<2x5x5x16xbf16>
    %36 = vector.shape_cast %35 : vector<2x5x5x16xbf16> to vector<50x16xbf16>
    %c4 = arith.constant 4 : index
    %c0_20 = arith.constant 0 : index
    %c0_21 = arith.constant 0 : index
    %37 = vector.load %arg4[%c4, %c0_20, %c0_21] : memref<9x16x16xbf16, #tpu.memory_space<vmem>>, vector<1x16x16xbf16>
    %38 = vector.shape_cast %37 : vector<1x16x16xbf16> to vector<16x16xbf16>
    %cst_22 = arith.constant dense<0.000000e+00> : vector<50x16xf32>
    %39 = tpu.matmul %36, %38, %cst_22 {dimension_numbers = #tpu.dot_dimension_numbers<[1], [0], [0], [1], [0, 0, 1, 1], [], []>} : vector<50x16xbf16>, vector<16x16xbf16>, vector<50x16xf32> -> vector<50x16xf32>
    %40 = arith.addf %34, %39 : vector<50x16xf32>
    %41 = vector.extract_strided_slice %9 {offsets = [0, 1, 2, 0], sizes = [2, 5, 5, 16], strides = [1, 1, 1, 1]} : vector<2x7x7x16xbf16> to vector<2x5x5x16xbf16>
    %42 = vector.shape_cast %41 : vector<2x5x5x16xbf16> to vector<50x16xbf16>
    %c5 = arith.constant 5 : index
    %c0_23 = arith.constant 0 : index
    %c0_24 = arith.constant 0 : index
    %43 = vector.load %arg4[%c5, %c0_23, %c0_24] : memref<9x16x16xbf16, #tpu.memory_space<vmem>>, vector<1x16x16xbf16>
    %44 = vector.shape_cast %43 : vector<1x16x16xbf16> to vector<16x16xbf16>
    %cst_25 = arith.constant dense<0.000000e+00> : vector<50x16xf32>
    %45 = tpu.matmul %42, %44, %cst_25 {dimension_numbers = #tpu.dot_dimension_numbers<[1], [0], [0], [1], [0, 0, 1, 1], [], []>} : vector<50x16xbf16>, vector<16x16xbf16>, vector<50x16xf32> -> vector<50x16xf32>
    %46 = arith.addf %40, %45 : vector<50x16xf32>
    %47 = vector.extract_strided_slice %9 {offsets = [0, 2, 0, 0], sizes = [2, 5, 5, 16], strides = [1, 1, 1, 1]} : vector<2x7x7x16xbf16> to vector<2x5x5x16xbf16>
    %48 = vector.shape_cast %47 : vector<2x5x5x16xbf16> to vector<50x16xbf16>
    %c6 = arith.constant 6 : index
    %c0_26 = arith.constant 0 : index
    %c0_27 = arith.constant 0 : index
    %49 = vector.load %arg4[%c6, %c0_26, %c0_27] : memref<9x16x16xbf16, #tpu.memory_space<vmem>>, vector<1x16x16xbf16>
    %50 = vector.shape_cast %49 : vector<1x16x16xbf16> to vector<16x16xbf16>
    %cst_28 = arith.constant dense<0.000000e+00> : vector<50x16xf32>
    %51 = tpu.matmul %48, %50, %cst_28 {dimension_numbers = #tpu.dot_dimension_numbers<[1], [0], [0], [1], [0, 0, 1, 1], [], []>} : vector<50x16xbf16>, vector<16x16xbf16>, vector<50x16xf32> -> vector<50x16xf32>
    %52 = arith.addf %46, %51 : vector<50x16xf32>
    %53 = vector.extract_strided_slice %9 {offsets = [0, 2, 1, 0], sizes = [2, 5, 5, 16], strides = [1, 1, 1, 1]} : vector<2x7x7x16xbf16> to vector<2x5x5x16xbf16>
    %54 = vector.shape_cast %53 : vector<2x5x5x16xbf16> to vector<50x16xbf16>
    %c7 = arith.constant 7 : index
    %c0_29 = arith.constant 0 : index
    %c0_30 = arith.constant 0 : index
    %55 = vector.load %arg4[%c7, %c0_29, %c0_30] : memref<9x16x16xbf16, #tpu.memory_space<vmem>>, vector<1x16x16xbf16>
    %56 = vector.shape_cast %55 : vector<1x16x16xbf16> to vector<16x16xbf16>
    %cst_31 = arith.constant dense<0.000000e+00> : vector<50x16xf32>
    %57 = tpu.matmul %54, %56, %cst_31 {dimension_numbers = #tpu.dot_dimension_numbers<[1], [0], [0], [1], [0, 0, 1, 1], [], []>} : vector<50x16xbf16>, vector<16x16xbf16>, vector<50x16xf32> -> vector<50x16xf32>
    %58 = arith.addf %52, %57 : vector<50x16xf32>
    %59 = vector.extract_strided_slice %9 {offsets = [0, 2, 2, 0], sizes = [2, 5, 5, 16], strides = [1, 1, 1, 1]} : vector<2x7x7x16xbf16> to vector<2x5x5x16xbf16>
    %60 = vector.shape_cast %59 : vector<2x5x5x16xbf16> to vector<50x16xbf16>
    %c8 = arith.constant 8 : index
    %c0_32 = arith.constant 0 : index
    %c0_33 = arith.constant 0 : index
    %61 = vector.load %arg4[%c8, %c0_32, %c0_33] : memref<9x16x16xbf16, #tpu.memory_space<vmem>>, vector<1x16x16xbf16>
    %62 = vector.shape_cast %61 : vector<1x16x16xbf16> to vector<16x16xbf16>
    %cst_34 = arith.constant dense<0.000000e+00> : vector<50x16xf32>
    %63 = tpu.matmul %60, %62, %cst_34 {dimension_numbers = #tpu.dot_dimension_numbers<[1], [0], [0], [1], [0, 0, 1, 1], [], []>} : vector<50x16xbf16>, vector<16x16xbf16>, vector<50x16xf32> -> vector<50x16xf32>
    %64 = arith.addf %58, %63 : vector<50x16xf32>
    %c0_35 = arith.constant 0 : index
    %c0_36 = arith.constant 0 : index
    %65 = vector.load %arg5[%c0_35, %c0_36] : memref<1x16xf32, #tpu.memory_space<vmem>>, vector<1x16xf32>
    %66 = vector.broadcast %65 : vector<1x16xf32> to vector<50x16xf32>
    %67 = arith.addf %64, %66 : vector<50x16xf32>
    %cst_37 = arith.constant 0.000000e+00 : f32
    %68 = vector.broadcast %cst_37 : f32 to vector<50x16xf32>
    %69 = arith.maximumf %67, %68 : vector<50x16xf32>
    %70 = arith.truncf %69 : vector<50x16xf32> to vector<50x16xbf16>
    %71 = vector.shape_cast %70 : vector<50x16xbf16> to vector<2x5x5x16xbf16>
    %cst_38 = arith.constant 0.000000e+00 : f32
    %72 = vector.broadcast %cst_38 : f32 to vector<18x16xf32>
    %73 = vector.extract_strided_slice %71 {offsets = [0, 0, 0, 0], sizes = [2, 3, 3, 16], strides = [1, 1, 1, 1]} : vector<2x5x5x16xbf16> to vector<2x3x3x16xbf16>
    %74 = vector.shape_cast %73 : vector<2x3x3x16xbf16> to vector<18x16xbf16>
    %c0_39 = arith.constant 0 : index
    %c0_40 = arith.constant 0 : index
    %c0_41 = arith.constant 0 : index
    %75 = vector.load %arg6[%c0_39, %c0_40, %c0_41] : memref<9x16x16xbf16, #tpu.memory_space<vmem>>, vector<1x16x16xbf16>
    %76 = vector.shape_cast %75 : vector<1x16x16xbf16> to vector<16x16xbf16>
    %cst_42 = arith.constant dense<0.000000e+00> : vector<18x16xf32>
    %77 = tpu.matmul %74, %76, %cst_42 {dimension_numbers = #tpu.dot_dimension_numbers<[1], [0], [0], [1], [0, 0, 1, 1], [], []>} : vector<18x16xbf16>, vector<16x16xbf16>, vector<18x16xf32> -> vector<18x16xf32>
    %78 = arith.addf %72, %77 : vector<18x16xf32>
    %79 = vector.extract_strided_slice %71 {offsets = [0, 0, 1, 0], sizes = [2, 3, 3, 16], strides = [1, 1, 1, 1]} : vector<2x5x5x16xbf16> to vector<2x3x3x16xbf16>
    %80 = vector.shape_cast %79 : vector<2x3x3x16xbf16> to vector<18x16xbf16>
    %c1_43 = arith.constant 1 : index
    %c0_44 = arith.constant 0 : index
    %c0_45 = arith.constant 0 : index
    %81 = vector.load %arg6[%c1_43, %c0_44, %c0_45] : memref<9x16x16xbf16, #tpu.memory_space<vmem>>, vector<1x16x16xbf16>
    %82 = vector.shape_cast %81 : vector<1x16x16xbf16> to vector<16x16xbf16>
    %cst_46 = arith.constant dense<0.000000e+00> : vector<18x16xf32>
    %83 = tpu.matmul %80, %82, %cst_46 {dimension_numbers = #tpu.dot_dimension_numbers<[1], [0], [0], [1], [0, 0, 1, 1], [], []>} : vector<18x16xbf16>, vector<16x16xbf16>, vector<18x16xf32> -> vector<18x16xf32>
    %84 = arith.addf %78, %83 : vector<18x16xf32>
    %85 = vector.extract_strided_slice %71 {offsets = [0, 0, 2, 0], sizes = [2, 3, 3, 16], strides = [1, 1, 1, 1]} : vector<2x5x5x16xbf16> to vector<2x3x3x16xbf16>
    %86 = vector.shape_cast %85 : vector<2x3x3x16xbf16> to vector<18x16xbf16>
    %c2_47 = arith.constant 2 : index
    %c0_48 = arith.constant 0 : index
    %c0_49 = arith.constant 0 : index
    %87 = vector.load %arg6[%c2_47, %c0_48, %c0_49] : memref<9x16x16xbf16, #tpu.memory_space<vmem>>, vector<1x16x16xbf16>
    %88 = vector.shape_cast %87 : vector<1x16x16xbf16> to vector<16x16xbf16>
    %cst_50 = arith.constant dense<0.000000e+00> : vector<18x16xf32>
    %89 = tpu.matmul %86, %88, %cst_50 {dimension_numbers = #tpu.dot_dimension_numbers<[1], [0], [0], [1], [0, 0, 1, 1], [], []>} : vector<18x16xbf16>, vector<16x16xbf16>, vector<18x16xf32> -> vector<18x16xf32>
    %90 = arith.addf %84, %89 : vector<18x16xf32>
    %91 = vector.extract_strided_slice %71 {offsets = [0, 1, 0, 0], sizes = [2, 3, 3, 16], strides = [1, 1, 1, 1]} : vector<2x5x5x16xbf16> to vector<2x3x3x16xbf16>
    %92 = vector.shape_cast %91 : vector<2x3x3x16xbf16> to vector<18x16xbf16>
    %c3_51 = arith.constant 3 : index
    %c0_52 = arith.constant 0 : index
    %c0_53 = arith.constant 0 : index
    %93 = vector.load %arg6[%c3_51, %c0_52, %c0_53] : memref<9x16x16xbf16, #tpu.memory_space<vmem>>, vector<1x16x16xbf16>
    %94 = vector.shape_cast %93 : vector<1x16x16xbf16> to vector<16x16xbf16>
    %cst_54 = arith.constant dense<0.000000e+00> : vector<18x16xf32>
    %95 = tpu.matmul %92, %94, %cst_54 {dimension_numbers = #tpu.dot_dimension_numbers<[1], [0], [0], [1], [0, 0, 1, 1], [], []>} : vector<18x16xbf16>, vector<16x16xbf16>, vector<18x16xf32> -> vector<18x16xf32>
    %96 = arith.addf %90, %95 : vector<18x16xf32>
    %97 = vector.extract_strided_slice %71 {offsets = [0, 1, 1, 0], sizes = [2, 3, 3, 16], strides = [1, 1, 1, 1]} : vector<2x5x5x16xbf16> to vector<2x3x3x16xbf16>
    %98 = vector.shape_cast %97 : vector<2x3x3x16xbf16> to vector<18x16xbf16>
    %c4_55 = arith.constant 4 : index
    %c0_56 = arith.constant 0 : index
    %c0_57 = arith.constant 0 : index
    %99 = vector.load %arg6[%c4_55, %c0_56, %c0_57] : memref<9x16x16xbf16, #tpu.memory_space<vmem>>, vector<1x16x16xbf16>
    %100 = vector.shape_cast %99 : vector<1x16x16xbf16> to vector<16x16xbf16>
    %cst_58 = arith.constant dense<0.000000e+00> : vector<18x16xf32>
    %101 = tpu.matmul %98, %100, %cst_58 {dimension_numbers = #tpu.dot_dimension_numbers<[1], [0], [0], [1], [0, 0, 1, 1], [], []>} : vector<18x16xbf16>, vector<16x16xbf16>, vector<18x16xf32> -> vector<18x16xf32>
    %102 = arith.addf %96, %101 : vector<18x16xf32>
    %103 = vector.extract_strided_slice %71 {offsets = [0, 1, 2, 0], sizes = [2, 3, 3, 16], strides = [1, 1, 1, 1]} : vector<2x5x5x16xbf16> to vector<2x3x3x16xbf16>
    %104 = vector.shape_cast %103 : vector<2x3x3x16xbf16> to vector<18x16xbf16>
    %c5_59 = arith.constant 5 : index
    %c0_60 = arith.constant 0 : index
    %c0_61 = arith.constant 0 : index
    %105 = vector.load %arg6[%c5_59, %c0_60, %c0_61] : memref<9x16x16xbf16, #tpu.memory_space<vmem>>, vector<1x16x16xbf16>
    %106 = vector.shape_cast %105 : vector<1x16x16xbf16> to vector<16x16xbf16>
    %cst_62 = arith.constant dense<0.000000e+00> : vector<18x16xf32>
    %107 = tpu.matmul %104, %106, %cst_62 {dimension_numbers = #tpu.dot_dimension_numbers<[1], [0], [0], [1], [0, 0, 1, 1], [], []>} : vector<18x16xbf16>, vector<16x16xbf16>, vector<18x16xf32> -> vector<18x16xf32>
    %108 = arith.addf %102, %107 : vector<18x16xf32>
    %109 = vector.extract_strided_slice %71 {offsets = [0, 2, 0, 0], sizes = [2, 3, 3, 16], strides = [1, 1, 1, 1]} : vector<2x5x5x16xbf16> to vector<2x3x3x16xbf16>
    %110 = vector.shape_cast %109 : vector<2x3x3x16xbf16> to vector<18x16xbf16>
    %c6_63 = arith.constant 6 : index
    %c0_64 = arith.constant 0 : index
    %c0_65 = arith.constant 0 : index
    %111 = vector.load %arg6[%c6_63, %c0_64, %c0_65] : memref<9x16x16xbf16, #tpu.memory_space<vmem>>, vector<1x16x16xbf16>
    %112 = vector.shape_cast %111 : vector<1x16x16xbf16> to vector<16x16xbf16>
    %cst_66 = arith.constant dense<0.000000e+00> : vector<18x16xf32>
    %113 = tpu.matmul %110, %112, %cst_66 {dimension_numbers = #tpu.dot_dimension_numbers<[1], [0], [0], [1], [0, 0, 1, 1], [], []>} : vector<18x16xbf16>, vector<16x16xbf16>, vector<18x16xf32> -> vector<18x16xf32>
    %114 = arith.addf %108, %113 : vector<18x16xf32>
    %115 = vector.extract_strided_slice %71 {offsets = [0, 2, 1, 0], sizes = [2, 3, 3, 16], strides = [1, 1, 1, 1]} : vector<2x5x5x16xbf16> to vector<2x3x3x16xbf16>
    %116 = vector.shape_cast %115 : vector<2x3x3x16xbf16> to vector<18x16xbf16>
    %c7_67 = arith.constant 7 : index
    %c0_68 = arith.constant 0 : index
    %c0_69 = arith.constant 0 : index
    %117 = vector.load %arg6[%c7_67, %c0_68, %c0_69] : memref<9x16x16xbf16, #tpu.memory_space<vmem>>, vector<1x16x16xbf16>
    %118 = vector.shape_cast %117 : vector<1x16x16xbf16> to vector<16x16xbf16>
    %cst_70 = arith.constant dense<0.000000e+00> : vector<18x16xf32>
    %119 = tpu.matmul %116, %118, %cst_70 {dimension_numbers = #tpu.dot_dimension_numbers<[1], [0], [0], [1], [0, 0, 1, 1], [], []>} : vector<18x16xbf16>, vector<16x16xbf16>, vector<18x16xf32> -> vector<18x16xf32>
    %120 = arith.addf %114, %119 : vector<18x16xf32>
    %121 = vector.extract_strided_slice %71 {offsets = [0, 2, 2, 0], sizes = [2, 3, 3, 16], strides = [1, 1, 1, 1]} : vector<2x5x5x16xbf16> to vector<2x3x3x16xbf16>
    %122 = vector.shape_cast %121 : vector<2x3x3x16xbf16> to vector<18x16xbf16>
    %c8_71 = arith.constant 8 : index
    %c0_72 = arith.constant 0 : index
    %c0_73 = arith.constant 0 : index
    %123 = vector.load %arg6[%c8_71, %c0_72, %c0_73] : memref<9x16x16xbf16, #tpu.memory_space<vmem>>, vector<1x16x16xbf16>
    %124 = vector.shape_cast %123 : vector<1x16x16xbf16> to vector<16x16xbf16>
    %cst_74 = arith.constant dense<0.000000e+00> : vector<18x16xf32>
    %125 = tpu.matmul %122, %124, %cst_74 {dimension_numbers = #tpu.dot_dimension_numbers<[1], [0], [0], [1], [0, 0, 1, 1], [], []>} : vector<18x16xbf16>, vector<16x16xbf16>, vector<18x16xf32> -> vector<18x16xf32>
    %126 = arith.addf %120, %125 : vector<18x16xf32>
    %c0_75 = arith.constant 0 : index
    %c0_76 = arith.constant 0 : index
    %127 = vector.load %arg7[%c0_75, %c0_76] : memref<1x16xf32, #tpu.memory_space<vmem>>, vector<1x16xf32>
    %128 = vector.broadcast %127 : vector<1x16xf32> to vector<18x16xf32>
    %129 = arith.addf %126, %128 : vector<18x16xf32>
    %cst_77 = arith.constant 0.000000e+00 : f32
    %130 = vector.broadcast %cst_77 : f32 to vector<18x16xf32>
    %131 = arith.maximumf %129, %130 : vector<18x16xf32>
    %132 = arith.truncf %131 : vector<18x16xf32> to vector<18x16xbf16>
    %133 = vector.shape_cast %132 : vector<18x16xbf16> to vector<2x3x3x16xbf16>
    %134 = vector.shape_cast %133 : vector<2x3x3x16xbf16> to vector<2x9x16xbf16>
    %cst_78 = arith.constant 0.000000e+00 : f32
    %135 = vector.broadcast %cst_78 : f32 to vector<2x32xf32>
    %136 = vector.extract_strided_slice %134 {offsets = [0, 0, 0], sizes = [2, 1, 16], strides = [1, 1, 1]} : vector<2x9x16xbf16> to vector<2x1x16xbf16>
    %137 = vector.shape_cast %136 : vector<2x1x16xbf16> to vector<2x16xbf16>
    %c0_79 = arith.constant 0 : index
    %c0_80 = arith.constant 0 : index
    %c0_81 = arith.constant 0 : index
    %138 = vector.load %arg8[%c0_79, %c0_80, %c0_81] : memref<9x16x32xbf16, #tpu.memory_space<vmem>>, vector<1x16x32xbf16>
    %139 = vector.shape_cast %138 : vector<1x16x32xbf16> to vector<16x32xbf16>
    %cst_82 = arith.constant dense<0.000000e+00> : vector<2x32xf32>
    %140 = tpu.matmul %137, %139, %cst_82 {dimension_numbers = #tpu.dot_dimension_numbers<[1], [0], [0], [1], [0, 0, 1, 1], [], []>} : vector<2x16xbf16>, vector<16x32xbf16>, vector<2x32xf32> -> vector<2x32xf32>
    %141 = arith.addf %135, %140 : vector<2x32xf32>
    %142 = vector.extract_strided_slice %134 {offsets = [0, 1, 0], sizes = [2, 1, 16], strides = [1, 1, 1]} : vector<2x9x16xbf16> to vector<2x1x16xbf16>
    %143 = vector.shape_cast %142 : vector<2x1x16xbf16> to vector<2x16xbf16>
    %c1_83 = arith.constant 1 : index
    %c0_84 = arith.constant 0 : index
    %c0_85 = arith.constant 0 : index
    %144 = vector.load %arg8[%c1_83, %c0_84, %c0_85] : memref<9x16x32xbf16, #tpu.memory_space<vmem>>, vector<1x16x32xbf16>
    %145 = vector.shape_cast %144 : vector<1x16x32xbf16> to vector<16x32xbf16>
    %cst_86 = arith.constant dense<0.000000e+00> : vector<2x32xf32>
    %146 = tpu.matmul %143, %145, %cst_86 {dimension_numbers = #tpu.dot_dimension_numbers<[1], [0], [0], [1], [0, 0, 1, 1], [], []>} : vector<2x16xbf16>, vector<16x32xbf16>, vector<2x32xf32> -> vector<2x32xf32>
    %147 = arith.addf %141, %146 : vector<2x32xf32>
    %148 = vector.extract_strided_slice %134 {offsets = [0, 2, 0], sizes = [2, 1, 16], strides = [1, 1, 1]} : vector<2x9x16xbf16> to vector<2x1x16xbf16>
    %149 = vector.shape_cast %148 : vector<2x1x16xbf16> to vector<2x16xbf16>
    %c2_87 = arith.constant 2 : index
    %c0_88 = arith.constant 0 : index
    %c0_89 = arith.constant 0 : index
    %150 = vector.load %arg8[%c2_87, %c0_88, %c0_89] : memref<9x16x32xbf16, #tpu.memory_space<vmem>>, vector<1x16x32xbf16>
    %151 = vector.shape_cast %150 : vector<1x16x32xbf16> to vector<16x32xbf16>
    %cst_90 = arith.constant dense<0.000000e+00> : vector<2x32xf32>
    %152 = tpu.matmul %149, %151, %cst_90 {dimension_numbers = #tpu.dot_dimension_numbers<[1], [0], [0], [1], [0, 0, 1, 1], [], []>} : vector<2x16xbf16>, vector<16x32xbf16>, vector<2x32xf32> -> vector<2x32xf32>
    %153 = arith.addf %147, %152 : vector<2x32xf32>
    %154 = vector.extract_strided_slice %134 {offsets = [0, 3, 0], sizes = [2, 1, 16], strides = [1, 1, 1]} : vector<2x9x16xbf16> to vector<2x1x16xbf16>
    %155 = vector.shape_cast %154 : vector<2x1x16xbf16> to vector<2x16xbf16>
    %c3_91 = arith.constant 3 : index
    %c0_92 = arith.constant 0 : index
    %c0_93 = arith.constant 0 : index
    %156 = vector.load %arg8[%c3_91, %c0_92, %c0_93] : memref<9x16x32xbf16, #tpu.memory_space<vmem>>, vector<1x16x32xbf16>
    %157 = vector.shape_cast %156 : vector<1x16x32xbf16> to vector<16x32xbf16>
    %cst_94 = arith.constant dense<0.000000e+00> : vector<2x32xf32>
    %158 = tpu.matmul %155, %157, %cst_94 {dimension_numbers = #tpu.dot_dimension_numbers<[1], [0], [0], [1], [0, 0, 1, 1], [], []>} : vector<2x16xbf16>, vector<16x32xbf16>, vector<2x32xf32> -> vector<2x32xf32>
    %159 = arith.addf %153, %158 : vector<2x32xf32>
    %160 = vector.extract_strided_slice %134 {offsets = [0, 4, 0], sizes = [2, 1, 16], strides = [1, 1, 1]} : vector<2x9x16xbf16> to vector<2x1x16xbf16>
    %161 = vector.shape_cast %160 : vector<2x1x16xbf16> to vector<2x16xbf16>
    %c4_95 = arith.constant 4 : index
    %c0_96 = arith.constant 0 : index
    %c0_97 = arith.constant 0 : index
    %162 = vector.load %arg8[%c4_95, %c0_96, %c0_97] : memref<9x16x32xbf16, #tpu.memory_space<vmem>>, vector<1x16x32xbf16>
    %163 = vector.shape_cast %162 : vector<1x16x32xbf16> to vector<16x32xbf16>
    %cst_98 = arith.constant dense<0.000000e+00> : vector<2x32xf32>
    %164 = tpu.matmul %161, %163, %cst_98 {dimension_numbers = #tpu.dot_dimension_numbers<[1], [0], [0], [1], [0, 0, 1, 1], [], []>} : vector<2x16xbf16>, vector<16x32xbf16>, vector<2x32xf32> -> vector<2x32xf32>
    %165 = arith.addf %159, %164 : vector<2x32xf32>
    %166 = vector.extract_strided_slice %134 {offsets = [0, 5, 0], sizes = [2, 1, 16], strides = [1, 1, 1]} : vector<2x9x16xbf16> to vector<2x1x16xbf16>
    %167 = vector.shape_cast %166 : vector<2x1x16xbf16> to vector<2x16xbf16>
    %c5_99 = arith.constant 5 : index
    %c0_100 = arith.constant 0 : index
    %c0_101 = arith.constant 0 : index
    %168 = vector.load %arg8[%c5_99, %c0_100, %c0_101] : memref<9x16x32xbf16, #tpu.memory_space<vmem>>, vector<1x16x32xbf16>
    %169 = vector.shape_cast %168 : vector<1x16x32xbf16> to vector<16x32xbf16>
    %cst_102 = arith.constant dense<0.000000e+00> : vector<2x32xf32>
    %170 = tpu.matmul %167, %169, %cst_102 {dimension_numbers = #tpu.dot_dimension_numbers<[1], [0], [0], [1], [0, 0, 1, 1], [], []>} : vector<2x16xbf16>, vector<16x32xbf16>, vector<2x32xf32> -> vector<2x32xf32>
    %171 = arith.addf %165, %170 : vector<2x32xf32>
    %172 = vector.extract_strided_slice %134 {offsets = [0, 6, 0], sizes = [2, 1, 16], strides = [1, 1, 1]} : vector<2x9x16xbf16> to vector<2x1x16xbf16>
    %173 = vector.shape_cast %172 : vector<2x1x16xbf16> to vector<2x16xbf16>
    %c6_103 = arith.constant 6 : index
    %c0_104 = arith.constant 0 : index
    %c0_105 = arith.constant 0 : index
    %174 = vector.load %arg8[%c6_103, %c0_104, %c0_105] : memref<9x16x32xbf16, #tpu.memory_space<vmem>>, vector<1x16x32xbf16>
    %175 = vector.shape_cast %174 : vector<1x16x32xbf16> to vector<16x32xbf16>
    %cst_106 = arith.constant dense<0.000000e+00> : vector<2x32xf32>
    %176 = tpu.matmul %173, %175, %cst_106 {dimension_numbers = #tpu.dot_dimension_numbers<[1], [0], [0], [1], [0, 0, 1, 1], [], []>} : vector<2x16xbf16>, vector<16x32xbf16>, vector<2x32xf32> -> vector<2x32xf32>
    %177 = arith.addf %171, %176 : vector<2x32xf32>
    %178 = vector.extract_strided_slice %134 {offsets = [0, 7, 0], sizes = [2, 1, 16], strides = [1, 1, 1]} : vector<2x9x16xbf16> to vector<2x1x16xbf16>
    %179 = vector.shape_cast %178 : vector<2x1x16xbf16> to vector<2x16xbf16>
    %c7_107 = arith.constant 7 : index
    %c0_108 = arith.constant 0 : index
    %c0_109 = arith.constant 0 : index
    %180 = vector.load %arg8[%c7_107, %c0_108, %c0_109] : memref<9x16x32xbf16, #tpu.memory_space<vmem>>, vector<1x16x32xbf16>
    %181 = vector.shape_cast %180 : vector<1x16x32xbf16> to vector<16x32xbf16>
    %cst_110 = arith.constant dense<0.000000e+00> : vector<2x32xf32>
    %182 = tpu.matmul %179, %181, %cst_110 {dimension_numbers = #tpu.dot_dimension_numbers<[1], [0], [0], [1], [0, 0, 1, 1], [], []>} : vector<2x16xbf16>, vector<16x32xbf16>, vector<2x32xf32> -> vector<2x32xf32>
    %183 = arith.addf %177, %182 : vector<2x32xf32>
    %184 = vector.extract_strided_slice %134 {offsets = [0, 8, 0], sizes = [2, 1, 16], strides = [1, 1, 1]} : vector<2x9x16xbf16> to vector<2x1x16xbf16>
    %185 = vector.shape_cast %184 : vector<2x1x16xbf16> to vector<2x16xbf16>
    %c8_111 = arith.constant 8 : index
    %c0_112 = arith.constant 0 : index
    %c0_113 = arith.constant 0 : index
    %186 = vector.load %arg8[%c8_111, %c0_112, %c0_113] : memref<9x16x32xbf16, #tpu.memory_space<vmem>>, vector<1x16x32xbf16>
    %187 = vector.shape_cast %186 : vector<1x16x32xbf16> to vector<16x32xbf16>
    %cst_114 = arith.constant dense<0.000000e+00> : vector<2x32xf32>
    %188 = tpu.matmul %185, %187, %cst_114 {dimension_numbers = #tpu.dot_dimension_numbers<[1], [0], [0], [1], [0, 0, 1, 1], [], []>} : vector<2x16xbf16>, vector<16x32xbf16>, vector<2x32xf32> -> vector<2x32xf32>
    %189 = arith.addf %183, %188 : vector<2x32xf32>
    %c0_115 = arith.constant 0 : index
    %c0_116 = arith.constant 0 : index
    %190 = vector.load %arg9[%c0_115, %c0_116] : memref<1x32xf32, #tpu.memory_space<vmem>>, vector<1x32xf32>
    %191 = vector.broadcast %190 : vector<1x32xf32> to vector<2x32xf32>
    %192 = arith.addf %189, %191 : vector<2x32xf32>
    %cst_117 = arith.constant 0.000000e+00 : f32
    %193 = vector.broadcast %cst_117 : f32 to vector<2x32xf32>
    %194 = arith.maximumf %192, %193 : vector<2x32xf32>
    %195 = arith.truncf %194 : vector<2x32xf32> to vector<2x32xbf16>
    %c0_118 = arith.constant 0 : index
    %c0_119 = arith.constant 0 : index
    %196 = vector.load %arg10[%c0_118, %c0_119] : memref<32x128xbf16, #tpu.memory_space<vmem>>, vector<32x128xbf16>
    %cst_120 = arith.constant dense<0.000000e+00> : vector<2x128xf32>
    %197 = tpu.matmul %195, %196, %cst_120 {dimension_numbers = #tpu.dot_dimension_numbers<[1], [0], [0], [1], [0, 0, 1, 1], [], []>} : vector<2x32xbf16>, vector<32x128xbf16>, vector<2x128xf32> -> vector<2x128xf32>
    %c0_121 = arith.constant 0 : index
    %c0_122 = arith.constant 0 : index
    %198 = vector.load %arg11[%c0_121, %c0_122] : memref<1x128xf32, #tpu.memory_space<vmem>>, vector<1x128xf32>
    %199 = vector.broadcast %198 : vector<1x128xf32> to vector<2x128xf32>
    %200 = arith.addf %197, %199 : vector<2x128xf32>
    %c0_123 = arith.constant 0 : index
    %c0_124 = arith.constant 0 : index
    %201 = vector.load %arg12[%c0_123, %c0_124] : memref<2x128xf32, #tpu.memory_space<vmem>>, vector<2x128xf32>
    tpu.vector_store %arg12[%c0_123, %c0_124], %200 {strides = array<i32>} : memref<2x128xf32, #tpu.memory_space<vmem>>, vector<2x128xf32>,
    return
  }
  func.func @transform_0(%arg0: i32) -> (i32, i32) {
    %c0_i32 = arith.constant 0 : i32
    %c0_i32_0 = arith.constant 0 : i32
    return %arg0, %c0_i32 : i32, i32
  }
  func.func @transform_1(%arg0: i32) -> (i32, i32) {
    %c0_i32 = arith.constant 0 : i32
    %c0_i32_0 = arith.constant 0 : i32
    %c0_i32_1 = arith.constant 0 : i32
    return %c0_i32, %c0_i32_0 : i32, i32
  }
  func.func @transform_2(%arg0: i32) -> (i32, i32) {
    %c0_i32 = arith.constant 0 : i32
    %c0_i32_0 = arith.constant 0 : i32
    %c0_i32_1 = arith.constant 0 : i32
    return %c0_i32, %c0_i32_0 : i32, i32
  }
  func.func @transform_3(%arg0: i32) -> (i32, i32, i32) {
    %c0_i32 = arith.constant 0 : i32
    %c0_i32_0 = arith.constant 0 : i32
    %c0_i32_1 = arith.constant 0 : i32
    %c0_i32_2 = arith.constant 0 : i32
    return %c0_i32, %c0_i32_0, %c0_i32_1 : i32, i32, i32
  }
  func.func @transform_4(%arg0: i32) -> (i32, i32) {
    %c0_i32 = arith.constant 0 : i32
    %c0_i32_0 = arith.constant 0 : i32
    %c0_i32_1 = arith.constant 0 : i32
    return %c0_i32, %c0_i32_0 : i32, i32
  }
  func.func @transform_5(%arg0: i32) -> (i32, i32, i32) {
    %c0_i32 = arith.constant 0 : i32
    %c0_i32_0 = arith.constant 0 : i32
    %c0_i32_1 = arith.constant 0 : i32
    %c0_i32_2 = arith.constant 0 : i32
    return %c0_i32, %c0_i32_0, %c0_i32_1 : i32, i32, i32
  }
  func.func @transform_6(%arg0: i32) -> (i32, i32) {
    %c0_i32 = arith.constant 0 : i32
    %c0_i32_0 = arith.constant 0 : i32
    %c0_i32_1 = arith.constant 0 : i32
    return %c0_i32, %c0_i32_0 : i32, i32
  }
  func.func @transform_7(%arg0: i32) -> (i32, i32, i32) {
    %c0_i32 = arith.constant 0 : i32
    %c0_i32_0 = arith.constant 0 : i32
    %c0_i32_1 = arith.constant 0 : i32
    %c0_i32_2 = arith.constant 0 : i32
    return %c0_i32, %c0_i32_0, %c0_i32_1 : i32, i32, i32
  }
  func.func @transform_8(%arg0: i32) -> (i32, i32) {
    %c0_i32 = arith.constant 0 : i32
    %c0_i32_0 = arith.constant 0 : i32
    %c0_i32_1 = arith.constant 0 : i32
    return %c0_i32, %c0_i32_0 : i32, i32
  }
  func.func @transform_9(%arg0: i32) -> (i32, i32) {
    %c0_i32 = arith.constant 0 : i32
    %c0_i32_0 = arith.constant 0 : i32
    %c0_i32_1 = arith.constant 0 : i32
    return %c0_i32, %c0_i32_0 : i32, i32
  }
  func.func @transform_10(%arg0: i32) -> (i32, i32) {
    %c0_i32 = arith.constant 0 : i32
    %c0_i32_0 = arith.constant 0 : i32
    %c0_i32_1 = arith.constant 0 : i32
    return %c0_i32, %c0_i32_0 : i32, i32
  }
  func.func @transform_11(%arg0: i32) -> (i32, i32) {
    %c0_i32 = arith.constant 0 : i32
    %c0_i32_0 = arith.constant 0 : i32
    return %arg0, %c0_i32 : i32, i32
  }
}

</mosaic_0001>

<bundles_post_ra>
// kernel: dqn_conv_forward.1
= control target key start
LH: loop header
LB: loop body
LE: loop exit
PB: predicated region body
PF: predicated region fallthrough
CT: control target
= control target key end

     0   :  { %v7684_v1 = vmov 0.0   ;;  %vm5983_vm0 = vmmov 0   ;;  %vm135_vm1 = vcmask 1041408   ;;  %vm113_vm2 = vcmask 293888   ;;  %s7672_s0 = inlined_call_operand.vmem [shape: bf16[98,36], index: 0, kind: input, shape index: {}]   ;;  %s7673_s1 = inlined_call_operand.vmem [shape: bf16[36,16], index: 1, kind: input, shape index: {}]   ;;  %s7674_s2 = inlined_call_operand.vmem [shape: f32[1,16], index: 2, kind: input, shape index: {}]   ;;  %s7675_s3 = inlined_call_operand.vmem [shape: bf16[9,16,16], index: 3, kind: input, shape index: {}]   ;;  %s7676_s4 = inlined_call_operand.vmem [shape: f32[1,16], index: 4, kind: input, shape index: {}]   ;;  %s7677_s5 = inlined_call_operand.vmem [shape: bf16[9,16,16], index: 5, kind: input, shape index: {}]   ;;  %s7678_s6 = inlined_call_operand.vmem [shape: f32[1,16], index: 6, kind: input, shape index: {}]   ;;  %s7679_s7 = inlined_call_operand.vmem [shape: bf16[9,16,32], index: 7, kind: input, shape index: {}]   ;;  %s7680_s8 = inlined_call_operand.vmem [shape: f32[1,32], index: 8, kind: input, shape index: {}]   ;;  %s7681_s9 = inlined_call_operand.vmem [shape: bf16[32,128], index: 9, kind: input, shape index: {}]   ;;  %s7682_s10 = inlined_call_operand.vmem [shape: f32[1,128], index: 10, kind: input, shape index: {}]   ;;  %s7683_s11 = inlined_call_operand.hbm [shape: f32[2,128], index: 11, kind: output, shape index: {}]  }
   0x1   :  { %v5919_v0 = vld [vmem:[%s7673_s1] sm:$0xff]   ;;  %5643 = vmatprep.subr.bf16.mxu0 %v7684_v1  ;;  %v5920_v2 = vld [vmem:[%s7673_s1 + $0x8] sm:$0xff]   ;;  %v5921_v3 = vld [vmem:[%s7673_s1 + $0x10] ss:$0 sps:$4 sm:$0x33]   ;;  %5649 = vmatprep.mubr.msk.bf16.mxu0 %vm5983_vm0, %v7684_v1 }
   0x2   :  { %5644 = vmatpush3.bf16.msra.mxu0 %v5919_v0  ;;  %v137_v4 = vsel %vm135_vm1, %v5921_v3, 0  ;;  %v5922_v5 = vld [vmem:[%s7672_s0] sm:$0xff]   ;;  %v5923_v6 = vld [vmem:[%s7672_s0 + $0x8] sm:$0xff]   ;;  %v5924_v7 = vld [vmem:[%s7672_s0 + $0x10] sm:$0xff]  }
   0x3   :  { %5645 = vmatprep.subr.bf16.mxu0 %v7684_v1 }
   0x6   :  { %5646 = vmatpush3.bf16.msra.mxu0 %v5920_v2 }
   0x7   :  { %5647 = vmatprep.subr.bf16.mxu0 %v7684_v1 }
   0xa   :  { %5648 = vmatpush3.bf16.msra.mxu0 %v137_v4 }
   0xd   :  { %5650 = vmatmul.mubr.msk.bf16.vlgmr.msra.gmra.mrb[0].mxu0 %vm113_vm2, %v5922_v5 }
   0xe   :  { %5653 = vmatprep.mubr.msk.bf16.mxu0 %vm5983_vm0, %v7684_v1 }
  0x15   :  { %5654 = vmatmul.mubr.msk.bf16.gmra.mrb[4].mxu0 %vm113_vm2, %v5923_v6 }
  0x16   :  { %5657 = vmatprep.mubr.msk.bf16.mxu0 %vm5983_vm0, %v7684_v1 }
  0x1d   :  { %5658 = vmatmul.mubr.msk.bf16.gmra.mrb[8].mxu0 %vm113_vm2, %v5924_v7 }
  0x1e   :  { %16 = vsyncpa [#allocation3], 0  ;;  %5661 = vmatprep.mubr.msk.bf16.mxu0 %vm5983_vm0, %v7684_v1  ;;  %v5925_v8 = vld [vmem:[%s7672_s0 + $0x18] sm:$0xff]   ;;  %v5926_v9 = vld [vmem:[%s7672_s0 + $0x20] sm:$0xff]   ;;  %v5984_v14 = vmov 1966171168   ;;  %v258_v16 = vlaneseq }
  0x1f   :  { %v5927_v10 = vld [vmem:[%s7672_s0 + $0x28] sm:$0xff]   ;;  %v5928_v11 = vld [vmem:[%s7672_s0 + $0x30] ss:$0 sps:$4 sm:$0x11]   ;;  %v6106_v13 = vld [vmem:[%s7675_s3] sm:$0xff]   ;;  %v256_v15 = vunpack.c.l.s4 %v5984_v14  ;;  %vm857_vm3 = vcmask 130048  }
  0x20   :  { %v5929_v12 = vld [vmem:[%s7675_s3 + $0x8] sm:$0xff]   ;;  %v6112_v17 = vld [vmem:[%s7674_s2] ss:$0 sm:$0xff]  ;;  %v259_v22 = vshrl.u32 %v258_v16, 7  ;;  %vm5175_vm4 = vcmask 261120  }
  0x21   :  { %5677 = vmatprep.subr.bf16.mxu1 %v5929_v12  ;;  %v257_v21 = vunpack.c.0.s8 %v256_v15 }
  0x22   :  { %5678 = vmatpush3.bf16.msra.mxu1 %v5929_v12 }
  0x23   :  { %5687 = vmatprep.subr.bf16.mxu1 %v6106_v13  ;;  %v6116_v28 = vsub.s32 %v257_v21, %v259_v22 }
  0x25   :  { %5662 = vmatmul.mubr.msk.bf16.gmra.mrb[12].mxu0 %vm113_vm2, %v5925_v8 }
  0x26   :  { %5665 = vmatprep.mubr.msk.bf16.mxu0 %vm5983_vm0, %v7684_v1 }
  0x2d   :  { %5666 = vmatmul.mubr.msk.bf16.gmra.mrb[16].mxu0 %vm113_vm2, %v5926_v9 }
  0x2e   :  { %5669 = vmatprep.mubr.msk.bf16.mxu0 %vm5983_vm0, %v7684_v1 }
  0x35   :  { %5670 = vmatmul.mubr.msk.bf16.gmra.mrb[20].mxu0 %vm113_vm2, %v5927_v10 }
  0x36   :  { %5673 = vmatprep.mubr.msk.bf16.mxu0 %vm5983_vm0, %v7684_v1 }
  0x3d   :  { %5674 = vmatmul.mubr.msk.bf16.gmra.mrb[24].mxu0 %vm113_vm2, %v5928_v11 }
  0xe0   :  { %v173_v18 = vpop.f32.mrb[0].mxu0 }
  0xe1   :  { %v174_v19 = vadd.f32 %v6112_v17, %v173_v18  ;;  %v5651_v20 = vpop.f32.mrb[1].mxu0 }
  0xe2   :  { %v176_v23 = vpop.f32.mrb[2].mxu0 }
  0xe3   :  { %v177_v24 = vadd.f32 %v6112_v17, %v176_v23  ;;  %v5652_v25 = vpop.f32.mrb[3].mxu0  ;;  %v227_v26 = vmax.f32 %v174_v19, 0.0 }
  0xe5   :  { %v228_v27 = vmax.f32 %v177_v24, 0.0 }
  0xe7   :  { %v240_v29 = vpack.c.bf16 %v228_v27, %v227_v26  ;;  %v5252_v33 = vpack.c.bf16 %v228_v27, %v228_v27 }
  0xe8   :  { %v181_v30 = vpop.f32.mrb[4].mxu0 }
  0xe9   :  { %v261_v31 = vrot.slane %v240_v29, %v6116_v28  ;;  %v5655_v32 = vpop.f32.mrb[5].mxu0  ;;  %v182_v34 = vadd.f32 %v6112_v17, %v181_v30  ;;  %v268_v39 = vrot.slane %v5252_v33, %v6116_v28 }
  0xea   :  { %v184_v35 = vpop.f32.mrb[6].mxu0 }
  0xeb   :  { %v5656_v36 = vpop.f32.mrb[7].mxu0  ;;  %v185_v37 = vadd.f32 %v6112_v17, %v184_v35  ;;  %v269_v38 = vcombine.high %v261_v31, %v261_v31  ;;  %v229_v40 = vmax.f32 %v182_v34, 0.0  ;;  %v6123_v42 = vrot.slane %v261_v31, %v6116_v28 }
  0xec   :  { %v270_v48 = vcombine.high %v268_v39, %v268_v39  ;;  %v6135_v53 = vrot.slane %v268_v39, %v6116_v28 }
  0xed   :  { %v230_v41 = vmax.f32 %v185_v37, 0.0  ;;  %v6126_v45 = vrot.slane %v269_v38, %v6116_v28  ;;  %v6131_v50 = vcombine.high %v6123_v42, %v6123_v42  ;;  %v563_v60 = vunpack.i.h.s16 %v6123_v42 }
  0xee   :  { %v6140_v59 = vrot.slane %v270_v48, %v6116_v28  ;;  %v6147_v3 = vcombine.high %v6135_v53, %v6135_v53  ;;  %v7688_v4 = vunpack.i.h.s16 %v6135_v53 }
  0xef   :  { %v241_v43 = vpack.c.bf16 %v230_v41, %v229_v40  ;;  %v5253_v54 = vpack.c.bf16 %v230_v41, %v230_v41  ;;  %v565_v58 = vunpack.i.h.s16 %v6126_v45  ;;  %v567_v63 = vunpack.i.h.s16 %v6131_v50 }
  0xf0   :  { %v189_v44 = vpop.f32.mrb[8].mxu0  ;;  %v6158_v14 = vcombine.high %v6140_v59, %v6140_v59  ;;  %v573_v15 = vunpack.i.h.s16 %v6140_v59  ;;  %v5260_v20 = vpack.i.b16 %v6126_v45, %v563_v60  ;;  %v6170_v25 = vpack.i.b16 %v6140_v59, %v7688_v4 }
  0xf1   :  { %v190_v46 = vadd.f32 %v6112_v17, %v189_v44  ;;  %v5659_v47 = vpop.f32.mrb[9].mxu0  ;;  %v310_v55 = vrot.slane %v241_v43, %v6116_v28  ;;  %v317_v0 = vrot.slane %v5253_v54, %v6116_v28  ;;  %v5261_v9 = vpack.i.b16 %v6131_v50, %v565_v58 }
  0xf2   :  { %v192_v49 = vpop.f32.mrb[10].mxu0  ;;  %7752 = vst [vmem:[#allocation5_spill] sm:$0xff] %v6158_v14  ;;  %v5262_v21 = vpack.i.b16 %v6135_v53, %v567_v63  ;;  %7753 = vst [vmem:[#allocation6_spill] sm:$0xff] %v6170_v25  ;;  %v6185_v34 = vpack.i.b16 %v6147_v3, %v573_v15  ;;  %v7686_v36 = vunpack.i.h.s16 %v6158_v14  ;;  %v6194_v38 = vpack.i.b16 %v6158_v14, %v573_v15 }
  0xf3   :  { %v193_v51 = vadd.f32 %v6112_v17, %v192_v49  ;;  %v5660_v52 = vpop.f32.mrb[11].mxu0  ;;  %v231_v56 = vmax.f32 %v190_v46, 0.0  ;;  %v318_v5 = vcombine.high %v310_v55, %v310_v55  ;;  %v319_v22 = vcombine.high %v317_v0, %v317_v0 }
  0xf4   :  { %v6164_v23 = vrot.slane %v310_v55, %v6116_v28  ;;  %v690_v30 = vcombine.low %v5260_v20, %v5261_v9  ;;  %7755 = vst [vmem:[#allocation8_spill] sm:$0xff] %v6185_v34  ;;  %v691_v37 = vcombine.low %v5262_v21, %v6170_v25  ;;  %v6203_v46 = vrot.slane %v317_v0, %v6116_v28 }
  0xf5   :  { %v232_v57 = vmax.f32 %v193_v51, 0.0  ;;  %v6173_v26 = vrot.slane %v318_v5, %v6116_v28  ;;  %v6197_v39 = vrot.slane %v319_v22, %v6116_v28 }
  0xf6   :  { %v579_v44 = vunpack.i.h.s16 %v6164_v23  ;;  %v6212_v51 = vrot.slane %v690_v30, %v6116_v28  ;;  %v6231_v63 = vcombine.high %v6164_v23, %v6164_v23 }
  0xf7   :  { %v242_v61 = vpack.c.bf16 %v232_v57, %v231_v56  ;;  %v5254_v62 = vpack.c.bf16 %v232_v57, %v232_v57  ;;  %7754 = vst [vmem:[#allocation7_spill] sm:$0xff] %v6173_v26  ;;  %7756 = vst [vmem:[#allocation9_spill] sm:$0xff] %v6197_v39  ;;  %v6209_v49 = vcombine.high %v6173_v26, %v6173_v26  ;;  %v581_v55 = vunpack.i.h.s16 %v6173_v26 }
  0xf8   :  { %v197_v2 = vpop.f32.mrb[12].mxu0  ;;  %v6218_v56 = vpack.i.b16 %v6164_v23, %v7686_v36  ;;  %v6235_v0 = vcombine.high %v6197_v39, %v6197_v39  ;;  %v6239_v5 = vpack.i.b16 %v6173_v26, %v579_v44 }
  0xf9   :  { %v359_v6 = vrot.slane %v242_v61, %v6116_v28  ;;  %v366_v7 = vrot.slane %v5254_v62, %v6116_v28  ;;  %v5663_v8 = vpop.f32.mrb[13].mxu0  ;;  %v198_v11 = vadd.f32 %v6112_v17, %v197_v2 }
  0xfa   :  { %v200_v12 = vpop.f32.mrb[14].mxu0  ;;  %7757 = vst [vmem:[#allocation10_spill] sm:$0xff] %v6218_v56  ;;  %7760 = vst [vmem:[#allocation13_spill] sm:$0xff] %v6239_v5 }
  0xfb   :  { %v367_v16 = vcombine.high %v359_v6, %v359_v6  ;;  %v368_v18 = vcombine.high %v366_v7, %v366_v7  ;;  %v5664_v19 = vpop.f32.mrb[15].mxu0  ;;  %v201_v24 = vadd.f32 %v6112_v17, %v200_v12  ;;  %v6182_v31 = vrot.slane %v366_v7, %v6116_v28 }
  0xfc   :  { %v233_v32 = vmax.f32 %v198_v11, 0.0  ;;  %v707_v7 = vrot.slane %v691_v37, %v6116_v28  ;;  %v7687_v12 = vunpack.i.h.s16 %v6209_v49  ;;  %v692_v19 = vcombine.low %v6185_v34, %v6218_v56 }
  0xfd   :  { %v6176_v27 = vrot.slane %v367_v16, %v6116_v28  ;;  %v6179_v29 = vrot.slane %v368_v18, %v6116_v28  ;;  %v234_v33 = vmax.f32 %v201_v24, 0.0  ;;  %v6252_v18 = vpack.i.b16 %v6209_v49, %v581_v55 }
  0xfe   :  { %v6257_v20 = vrot.slane %v359_v6, %v6116_v28  ;;  %v6269_v30 = vcombine.high %v6182_v31, %v6182_v31  ;;  %v6274_v6 = vpack.i.b16 %v6231_v63, %v581_v55  ;;  %v714_v10 = vrot.slane %v692_v19, %v6116_v28 }
  0xff   :  { %v6189_v35 = vcombine.high %v6176_v27, %v6176_v27  ;;  %v5394_v40 = vcombine.high %v6182_v31, %v6179_v29  ;;  %v243_v41 = vpack.c.bf16 %v234_v33, %v233_v32  ;;  %v5255_v52 = vpack.c.bf16 %v234_v33, %v234_v33  ;;  %7762 = vst [vmem:[#allocation15_spill] sm:$0xff] %v6252_v18 }
 0x100   :  { %v205_v43 = vpop.f32.mrb[16].mxu0  ;;  %v722_v33 = vcombine.low %v6212_v51, %v707_v7  ;;  %7763 = vst [vmem:[#allocation16_spill] sm:$0xff] %v6274_v6  ;;  %v607_v8 = vunpack.i.h.s16 %v6269_v30  ;;  %v6311_v1 = vcombine.high %v6257_v20, %v6257_v20  ;;  %v6316_v57 = vunpack.i.h.s16 %v6257_v20 }
 0x101   :  { %v2777_v47 = vcombine.low %v6189_v35, %v6182_v31  ;;  %v5667_v48 = vpop.f32.mrb[17].mxu0  ;;  %v6226_v60 = vrot.slane %v5394_v40, %v6116_v28  ;;  %v408_v61 = vrot.slane %v243_v41, %v6116_v28  ;;  %v415_v2 = vrot.slane %v5255_v52, %v6116_v28 }
 0x102   :  { %v208_v54 = vpop.f32.mrb[18].mxu0  ;;  %7767 = vst [vmem:[#allocation20_spill] sm:$0xff] %v6311_v1  ;;  %7768 = vst [vmem:[#allocation21_spill] sm:$0xff] %v6316_v57  ;;  %v2290_v4 = vcombine.low %v6179_v29, %v6269_v30 }
 0x103   :  { %v6223_v58 = vrot.slane %v2777_v47, %v6116_v28  ;;  %7759 = vst [vmem:[#allocation12_spill] sm:$0xff] %v6226_v60  ;;  %v5668_v62 = vpop.f32.mrb[19].mxu0  ;;  %v416_v9 = vcombine.high %v408_v61, %v408_v61  ;;  %v6245_v11 = vrot.slane %v408_v61, %v6116_v28  ;;  %v417_v15 = vcombine.high %v415_v2, %v415_v2 }
 0x104   :  { %v6249_v16 = vrot.slane %v415_v2, %v6116_v28  ;;  %v6287_v47 = vpack.i.b16 %v6203_v46, %v7687_v12  ;;  %v693_v61 = vcombine.low %v6239_v5, %v6252_v18  ;;  %v605_v2 = vunpack.i.h.s16 %v6179_v29 }
 0x105   :  { %7758 = vst [vmem:[#allocation11_spill] sm:$0xff] %v6223_v58  ;;  %7761 = vst [vmem:[#allocation14_spill] sm:$0xff] %v6245_v11  ;;  %v6260_v21 = vrot.slane %v416_v9, %v6116_v28  ;;  %v6264_v22 = vcombine.high %v6245_v11, %v6245_v11  ;;  %v611_v24 = vunpack.i.h.s16 %v6245_v11  ;;  %v6277_v40 = vrot.slane %v417_v15, %v6116_v28 }
 0x106   :  { %v7689_v32 = vunpack.i.h.s16 %v6249_v16  ;;  %7764 = vst [vmem:[#allocation17_spill] sm:$0xff] %v6287_v47  ;;  %v206_v15 = vadd.f32 %v6112_v17, %v205_v43  ;;  %v209_v36 = vadd.f32 %v6112_v17, %v208_v54  ;;  %v5340_v12 = vcombine.high %v6257_v20, %v6176_v27 }
 0x107   :  { %v6281_v41 = vcombine.high %v6260_v21, %v6260_v21  ;;  %v5292_v44 = vpack.i.b16 %v611_v24, %v6257_v20  ;;  %v1011_v52 = vcombine.low %v6264_v22, %v6249_v16  ;;  %v6332_v9 = vpack.i.b16 %v6269_v30, %v605_v2 }
 0x108   :  { %v213_v37 = vpop.f32.mrb[20].mxu0  ;;  %v6295_v55 = vpack.i.b16 %v7689_v32, %v6182_v31  ;;  %v236_v51 = vmax.f32 %v209_v36, 0.0  ;;  %v6344_v30 = vcombine.high %v6203_v46, %v6203_v46  ;;  %v730_v36 = vrot.slane %v722_v33, %v6116_v28 }
 0x109   :  { %v5671_v48 = vpop.f32.mrb[21].mxu0  ;;  %v1010_v7 = vcombine.low %v5292_v44, %v6260_v21  ;;  %v721_v44 = vrot.slane %v693_v61, %v6116_v28  ;;  %7769 = vst [vmem:[#allocation22_spill] sm:$0xff] %v6332_v9  ;;  %v214_v60 = vadd.f32 %v6112_v17, %v213_v37  ;;  %v7694_v37 = vunpack.i.h.s16 %v6311_v1 }
 0x10a   :  { %7765 = vst [vmem:[#allocation18_spill] sm:$0xff] %v6295_v55  ;;  %v216_v62 = vpop.f32.mrb[22].mxu0  ;;  %v6306_v48 = vcombine.high %v6179_v29, %v6179_v29  ;;  %v5256_v11 = vpack.c.bf16 %v236_v51, %v236_v51  ;;  %v6353_v33 = vrot.slane %v5340_v12, %v6116_v28 }
 0x10b   :  { %v5672_v24 = vpop.f32.mrb[23].mxu0  ;;  %v6319_v43 = vrot.slane %v1010_v7, %v6116_v28  ;;  %v723_v32 = vcombine.low %v714_v10, %v721_v44  ;;  %v217_v29 = vadd.f32 %v6112_v17, %v216_v62  ;;  %v6369_v12 = vpack.i.b16 %v6189_v35, %v7694_v37 }
 0x10c   :  { %7766 = vst [vmem:[#allocation19_spill] sm:$0xff] %v6306_v48  ;;  %v6322_v24 = vrot.slane %v1011_v52, %v6116_v28  ;;  %v235_v52 = vmax.f32 %v206_v15, 0.0  ;;  %v6337_v54 = vpack.i.b16 %v6306_v48, %v607_v8  ;;  %v237_v15 = vmax.f32 %v214_v60, 0.0  ;;  %7771 = vst [vmem:[#allocation24_spill] sm:$0xff] %v6353_v33 }
 0x10d   :  { %v737_v8 = vrot.slane %v723_v32, %v6116_v28  ;;  %v238_v10 = vmax.f32 %v217_v29, 0.0  ;;  %v6356_v60 = vrot.slane %v2290_v4, %v6116_v28  ;;  %v613_v32 = vunpack.i.h.s16 %v6260_v21 }
 0x10e   :  { %7770 = vst [vmem:[#allocation23_spill] sm:$0xff] %v6337_v54  ;;  %v244_v19 = vpack.c.bf16 %v236_v51, %v235_v52  ;;  %v7695_v51 = vunpack.i.h.s16 %v6203_v46  ;;  %v7696_v29 = vunpack.i.h.s16 %v6344_v30  ;;  %v7777_v4 = vunpack.i.h.s16 %v6249_v16 }
 0x10f   :  { %v738_v7 = vcombine.low %v730_v36, %v737_v8  ;;  %v245_v18 = vpack.c.bf16 %v238_v10, %v237_v15  ;;  %7772 = vst [vmem:[#allocation25_spill] sm:$0xff] %v6356_v60  ;;  %v615_v36 = vunpack.i.h.s16 %v6264_v22  ;;  %v593_v15 = vunpack.i.h.s16 %v6235_v0 }
 0x110   :  { %v221_v58 = vpop.f32.mrb[24].mxu0  ;;  %v457_v62 = vrot.slane %v244_v19, %v6116_v28  ;;  %v6396_v19 = vpack.i.b16 %v6277_v40, %v7777_v4 }
 0x111   :  { %v222_v61 = vadd.f32 %v6112_v17, %v221_v58  ;;  %v5675_v2 = vpop.f32.mrb[25].mxu0  ;;  %v464_v58 = vrot.slane %v5256_v11, %v6116_v28  ;;  %5679 = vmatprep.mubr.msk.bf16.mxu1 %vm857_vm3, %v738_v7  ;;  %v5272_v7 = vpack.i.b16 %v6260_v21, %v6316_v57  ;;  %v6390_v37 = vpack.i.b16 %v6257_v20, %v593_v15 }
 0x112   :  { %v224_v44 = vpop.f32.mrb[26].mxu0  ;;  %v5257_v2 = vpack.c.bf16 %v238_v10, %v238_v10  ;;  %v465_v8 = vcombine.high %v457_v62, %v457_v62  ;;  %v5273_v21 = vpack.i.b16 %v6264_v22, %v613_v32  ;;  %7778 = vst [vmem:[#allocation30_spill] sm:$0xff] %v6396_v19 }
 0x113   :  { %v239_v52 = vmax.f32 %v222_v61, 0.0  ;;  %v5676_v17 = vpop.f32.mrb[27].mxu0  ;;  %v466_v10 = vcombine.high %v464_v58, %v464_v58  ;;  %7776 = vst [vmem:[#allocation29_spill] sm:$0xff] %v6390_v37 }
 0x114   :  { %v6363_v61 = vrot.slane %v5257_v2, %v6116_v28  ;;  %v6387_v2 = vpack.i.b16 %v6235_v0, %v7696_v29  ;;  %v6404_v29 = vrot.slane %v465_v8, %v6116_v28  ;;  %v741_v60 = vcombine.low %v5272_v7, %v5273_v21 }
 0x115   :  { %v246_v11 = vpack.c.bf16 %v239_v52, %v239_v52  ;;  %v6381_v52 = vpack.i.b16 %v6197_v39, %v7695_v51  ;;  %v506_v51 = vrot.slane %v245_v18, %v6116_v28  ;;  %v6411_v4 = vrot.slane %v466_v10, %v6116_v28 }
 0x116   :  { %7773 = vst [vmem:[#allocation26_spill] sm:$0xff] %v6363_v61  ;;  %v515_v44 = vcombine.high %v6363_v61, %v6363_v61  ;;  %7775 = vst [vmem:[#allocation28_spill] sm:$0xff] %v6387_v2  ;;  %v740_v54 = vcombine.low %v6387_v2, %v6390_v37  ;;  %v6422_v8 = vrot.slane %v457_v62, %v6116_v28  ;;  %v7783_v21 = vunpack.i.h.s16 %v6189_v35 }
 0x117   :  { %7774 = vst [vmem:[#allocation27_spill] sm:$0xff] %v6381_v52  ;;  %v554_v17 = vrot.slane %v246_v11, %v6116_v28  ;;  %v5274_v11 = vpack.i.b16 %v6281_v41, %v615_v36  ;;  %v739_v15 = vcombine.low %v6287_v47, %v6381_v52  ;;  %v763_v7 = vrot.slane %v741_v60, %v6116_v28 }
 0x118   :  { %v6400_v9 = vrot.slane %v515_v44, %v6116_v28  ;;  %v6426_v2 = vrot.slane %v740_v54, %v6116_v28  ;;  %v6431_v10 = vcombine.high %v6249_v16, %v6249_v16  ;;  %v6444_v54 = vrot.slane %v464_v58, %v6116_v28 }
 0x119   :  { %v6418_v44 = vrot.slane %v554_v17, %v6116_v28  ;;  %v742_v36 = vcombine.low %v5274_v11, %v6396_v19  ;;  %v749_v33 = vrot.slane %v739_v15, %v6116_v28  ;;  %v6436_v17 = vpack.i.b16 %v6182_v31, %v7783_v21 }
 0x11a   :  { %7779 = vst [vmem:[#allocation31_spill] sm:$0xff] %v6400_v9  ;;  %v6415_v18 = vcombine.high %v6400_v9, %v6400_v9  ;;  %7782 = vst [vmem:[#allocation34_spill] sm:$0xff] %v6426_v2  ;;  %v6441_v15 = vpack.i.b16 %v613_v32, %v6176_v27  ;;  %v514_v60 = vcombine.high %v506_v51, %v506_v51  ;;  %v7788_v61 = vunpack.i.h.s16 %v6404_v29 }
 0x11b   :  { %7781 = vst [vmem:[#allocation33_spill] sm:$0xff] %v6418_v44  ;;  %v770_v62 = vrot.slane %v742_v36, %v6116_v28  ;;  %v771_v9 = vcombine.low %v749_v33, %v6426_v2  ;;  %v6449_v34 = vcombine.high %v6411_v4, %v6411_v4  ;;  %v6456_v36 = vcombine.high %v6404_v29, %v6404_v29 }
 0x11c   :  { %7780 = vst [vmem:[#allocation32_spill] sm:$0xff] %v6415_v18  ;;  %v657_v11 = vunpack.i.h.s16 %v6415_v18  ;;  %v6459_v32 = vrot.slane %v506_v51, %v6116_v28  ;;  %v621_v18 = vunpack.i.h.s16 %v6277_v40  ;;  %v6464_v33 = vunpack.i.h.s16 %v6422_v8 }
 0x11d   :  { %v772_v52 = vcombine.low %v763_v7, %v770_v62  ;;  %v779_v58 = vrot.slane %v771_v9, %v6116_v28  ;;  %v6476_v9 = vcombine.high %v6422_v8, %v6422_v8  ;;  %v635_v51 = vunpack.i.h.s16 %v6444_v54  ;;  %v6488_v7 = vld [vmem:[%s7675_s3 + $0x10] sm:$0xff]  }
 0x11e   :  { %v6452_v21 = vpack.i.b16 %v6418_v44, %v657_v11  ;;  %7785 = vst [vmem:[#allocation36_spill] sm:$0xff] %v6464_v33  ;;  %v623_v11 = vunpack.i.h.s16 %v6431_v10  ;;  %v6472_v44 = vcombine.high %v6277_v40, %v6277_v40  ;;  %v6482_v57 = vpack.i.b16 %v6431_v10, %v621_v18 }
 0x11f   :  { %v786_v6 = vrot.slane %v772_v52, %v6116_v28  ;;  %7786 = vst [vmem:[#allocation37_spill] sm:$0xff] %v6476_v9  ;;  %v6492_v2 = vpack.i.b16 %v6404_v29, %v6464_v33  ;;  %v6505_v52 = vpack.i.b16 %v6411_v4, %v635_v51  ;;  %v7794_v25 = vunpack.i.h.s16 %v6449_v34 }
 0x120   :  { %7784 = vst [vmem:[#allocation35_spill] sm:$0xff] %v6452_v21  ;;  %v7720_v21 = vunpack.i.h.s16 %v6411_v4  ;;  %v5277_v62 = vpack.i.b16 %v6422_v8, %v623_v11 }
 0x121   :  { %v787_v37 = vcombine.low %v779_v58, %v786_v6  ;;  %7787 = vst [vmem:[#allocation38_spill] sm:$0xff] %v6492_v2  ;;  %v6497_v6 = vpack.i.b16 %v6476_v9, %v7788_v61  ;;  %v7790_v58 = vunpack.i.h.s16 %v6456_v36  ;;  %7792 = vst [vmem:[#allocation41_spill] sm:$0xff] %v6505_v52  ;;  %v6516_v61 = vpack.i.b16 %v6459_v32, %v7794_v25 }
 0x122   :  { %v6511_v55 = vpack.i.b16 %v6449_v34, %v7720_v21  ;;  %v788_v47 = vcombine.low %v6482_v57, %v5277_v62  ;;  %v6530_v21 = vpack.i.b16 %v6472_v44, %v623_v11  ;;  %v7798_v62 = vunpack.i.h.s16 %v6189_v35 }
 0x123   :  { %7789 = vst [vmem:[#allocation39_spill] sm:$0xff] %v6497_v6  ;;  %v6502_v18 = vpack.i.b16 %v6444_v54, %v7790_v58  ;;  %5680 = vmatmul.mubr.msk.bf16.vlgmr.msra.gmra.mrb[0].mxu1 %vm857_vm3, %v787_v37  ;;  %v7795_v58 = vunpack.i.h.s16 %v6182_v31  ;;  %v789_v37 = vcombine.low %v6492_v2, %v6497_v6  ;;  %v1271_v11 = vcombine.low %v6441_v15, %v6264_v22 }
 0x124   :  { %7793 = vst [vmem:[#allocation42_spill] sm:$0xff] %v6511_v55  ;;  %5688 = vmatpush3.bf16.msra.mxu1 %v6106_v13  ;;  %7797 = vst [vmem:[#allocation44_spill] sm:$0xff] %v6530_v21  ;;  %v6537_v31 = vpack.i.b16 %v6249_v16, %v7798_v62  ;;  %v791_v13 = vcombine.low %v6511_v55, %v6516_v61  ;;  %v798_v25 = vrot.slane %v788_v47, %v6116_v28 }
 0x125   :  { %7791 = vst [vmem:[#allocation40_spill] sm:$0xff] %v6502_v18  ;;  %v6522_v5 = vpack.i.b16 %v6277_v40, %v7795_v58  ;;  %v790_v51 = vcombine.low %v6502_v18, %v6505_v52  ;;  %v6540_v58 = vrot.slane %v514_v60, %v6116_v28  ;;  %5697 = vmatprep.subr.bf16.mxu1 %v6488_v7  ;;  %v7727_v62 = vunpack.i.h.s16 %v6459_v32 }
 0x126   :  { %v805_v35 = vrot.slane %v789_v37, %v6116_v28  ;;  %v819_v60 = vrot.slane %v791_v13, %v6116_v28  ;;  %v6558_v55 = vcombine.high %v6126_v45, %v6126_v45  ;;  %v961_v47 = vcombine.low %v6140_v59, %v6158_v14 }
 0x127   :  { %7796 = vst [vmem:[#allocation43_spill] sm:$0xff] %v6522_v5  ;;  %v6552_v16 = vrot.slane %v790_v51, %v6116_v28  ;;  %v1008_v37 = vcombine.low %v6209_v49, %v6203_v46  ;;  %v6573_v6 = vpack.i.b16 %v6540_v58, %v7727_v62  ;;  %v7801_v22 = vcombine.low %v6281_v41, %v6277_v40 }
 0x128   :  { %v820_v18 = vcombine.low %v798_v25, %v805_v35  ;;  %v7802_v35 = vunpack.i.h.s16 %v6231_v63  ;;  %v6599_v5 = vrot.slane %v1271_v11, %v6116_v28  ;;  %v983_v21 = vrot.slane %v961_v47, %v6116_v28 }
 0x129   :  { %7799 = vst [vmem:[#allocation45_spill] sm:$0xff] %v6552_v16  ;;  %v821_v13 = vcombine.low %v6552_v16, %v819_v60  ;;  %7800 = vst [vmem:[#allocation46_spill] sm:$0xff] %v6573_v6  ;;  %v6580_v15 = vrot.slane %v7801_v22, %v6116_v28  ;;  %v5295_v60 = vcombine.high %v6203_v46, %v6197_v39  ;;  %v7804_v22 = vunpack.i.h.s16 %v6558_v55 }
 0x12a   :  { %v828_v25 = vrot.slane %v820_v18, %v6116_v28  ;;  %v6586_v51 = vpack.i.b16 %v7802_v35, %v6173_v26  ;;  %v843_v52 = vrot.slane %v6573_v6, %v6116_v28  ;;  %v6609_v41 = vcombine.high %v6444_v54, %v6444_v54 }
 0x12b   :  { %v835_v62 = vrot.slane %v821_v13, %v6116_v28  ;;  %v5290_v18 = vpack.i.b16 %v7804_v22, %v6131_v50  ;;  %v1018_v13 = vrot.slane %v1008_v37, %v6116_v28  ;;  %v1025_v2 = vrot.slane %v5295_v60, %v6116_v28 }
 0x12c   :  { %7803 = vst [vmem:[#allocation47_spill] sm:$0xff] %v6586_v51  ;;  %v962_v35 = vcombine.low %v6164_v23, %v6586_v51  ;;  %v850_v22 = vrot.slane %v843_v52, %v6116_v28  ;;  %v6614_v6 = vunpack.i.h.s16 %v6472_v44  ;;  %v1058_v47 = vcombine.low %v6422_v8, %v6404_v29 }
 0x12d   :  { %v836_v16 = vcombine.low %v828_v25, %v835_v62  ;;  %v960_v14 = vcombine.low %v5290_v18, %v6135_v53  ;;  %v7805_v62 = vcombine.low %v6123_v42, %v6126_v45  ;;  %v1040_v60 = vcombine.low %v1018_v13, %v1025_v2 }
 0x12e   :  { %v990_v11 = vrot.slane %v962_v35, %v6116_v28  ;;  %v7737_v52 = vunpack.i.h.s16 %v6609_v41  ;;  %v7806_v51 = vcombine.low %v6319_v43, %v6322_v24  ;;  %v5293_v19 = vpack.i.b16 %v6614_v6, %v6431_v10 }
 0x12f   :  { %5683 = vmatprep.mubr.msk.bf16.mxu1 %vm857_vm3, %v836_v16  ;;  %v969_v37 = vrot.slane %v7805_v62, %v6116_v28  ;;  %v976_v25 = vrot.slane %v960_v14, %v6116_v28  ;;  %v1059_v2 = vcombine.low %v6456_v36, %v6444_v54  ;;  %v1074_v24 = vrot.slane %v1058_v47, %v6116_v28 }
 0x130   :  { %5684 = vmatmul.mubr.msk.bf16.gmra.mrb[4].mxu1 %vm857_vm3, %v850_v22  ;;  %v992_v35 = vcombine.low %v983_v21, %v990_v11  ;;  %v1055_v16 = vrot.slane %v7806_v51, %v6116_v28  ;;  %v6636_v14 = vpack.i.b16 %v7737_v52, %v6411_v4  ;;  %v1112_v21 = vrot.slane %v6459_v32, %v6116_v28 }
 0x131   :  { %v991_v42 = vcombine.low %v969_v37, %v976_v25  ;;  %v1057_v43 = vcombine.low %v6277_v40, %v5293_v19  ;;  %v1048_v11 = vrot.slane %v1040_v60, %v6116_v28  ;;  %v7808_v37 = vunpack.i.h.s16 %v6135_v53 }
 0x132   :  { %7807 = vst [vmem:[#allocation48_spill] sm:$0xff] %v6636_v14  ;;  %v1006_v13 = vrot.slane %v992_v35, %v6116_v28  ;;  %v1060_v62 = vcombine.low %v6636_v14, %v6449_v34  ;;  %v7809_v19 = vunpack.i.h.s16 %v6209_v49  ;;  %v1220_v51 = vcombine.low %v6126_v45, %v6131_v50 }
 0x133   :  { %v999_v22 = vrot.slane %v991_v42, %v6116_v28  ;;  %v5303_v25 = vpack.i.b16 %v7808_v37, %v6558_v55  ;;  %v1067_v35 = vrot.slane %v1057_v43, %v6116_v28  ;;  %v1222_v60 = vcombine.low %v6147_v3, %v6164_v23 }
 0x134   :  { %v6658_v47 = vpack.i.b16 %v7809_v19, %v6231_v63  ;;  %v1081_v52 = vrot.slane %v1059_v2, %v6116_v28  ;;  %v1088_v18 = vrot.slane %v1060_v62, %v6116_v28  ;;  %v1056_v14 = vcombine.low %v1048_v11, %v1055_v16  ;;  %v6672_v19 = vld [vmem:[%s7675_s3 + $0x18] sm:$0xff]  }
 0x135   :  { %v1007_v42 = vcombine.low %v999_v22, %v1006_v13  ;;  %v1221_v37 = vcombine.low %v5303_v25, %v6140_v59  ;;  %v1089_v43 = vcombine.low %v1067_v35, %v1074_v24  ;;  %v1269_v45 = vcombine.low %v6203_v46, %v6197_v39 }
 0x136   :  { %7810 = vst [vmem:[#allocation49_spill] sm:$0xff] %v6658_v47  ;;  %v1223_v48 = vcombine.low %v6173_v26, %v6658_v47  ;;  %v1090_v50 = vcombine.low %v1081_v52, %v1088_v18  ;;  %v1230_v2 = vrot.slane %v1220_v51, %v6116_v28  ;;  %v1244_v16 = vrot.slane %v1222_v60, %v6116_v28 }
 0x137   :  { %5689 = vmatprep.mubr.msk.bf16.mxu1 %vm857_vm3, %v1007_v42  ;;  %v1237_v13 = vrot.slane %v1221_v37, %v6116_v28  ;;  %v1270_v22 = vcombine.low %v6235_v0, %v6257_v20  ;;  %v1302_v11 = vcombine.low %v6599_v5, %v6580_v15  ;;  %v5306_v62 = vpack.i.b16 %v6464_v33, %v6472_v44 }
 0x138   :  { %5690 = vmatmul.mubr.msk.bf16.vlgmr.msra.gmra.mrb[0].mxu1 %vm857_vm3, %v1056_v14  ;;  %v1251_v24 = vrot.slane %v1223_v48, %v6116_v28  ;;  %v1097_v52 = vrot.slane %v1089_v43, %v6116_v28  ;;  %v1104_v18 = vrot.slane %v1090_v50, %v6116_v28  ;;  %v7811_v14 = vunpack.i.h.s16 %v6449_v34 }
 0x139   :  { %5698 = vmatpush3.bf16.msra.mxu1 %v6488_v7  ;;  %v1252_v51 = vcombine.low %v1230_v2, %v1237_v13  ;;  %v7813_v25 = vcombine.low %v6369_v12, %v6436_v17  ;;  %v7814_v44 = vunpack.i.h.s16 %v6176_v27  ;;  %v1318_v35 = vcombine.low %v6431_v10, %v5306_v62 }
 0x13a   :  { %v6694_v48 = vpack.i.b16 %v7811_v14, %v6609_v41  ;;  %v1253_v15 = vcombine.low %v1244_v16, %v1251_v24  ;;  %5707 = vmatprep.subr.bf16.mxu1 %v6672_v19  ;;  %v6709_v60 = vcombine.high %v6459_v32, %v6459_v32  ;;  %v1105_v42 = vcombine.low %v1097_v52, %v1104_v18 }
 0x13b   :  { %v6700_v5 = vrot.slane %v7813_v25, %v6116_v28  ;;  %v5319_v7 = vpack.i.b16 %v6311_v1, %v7814_v44  ;;  %v1319_v37 = vcombine.low %v6404_v29, %v6476_v9  ;;  %v1320_v17 = vcombine.low %v6444_v54, %v6411_v4 }
 0x13c   :  { %7812 = vst [vmem:[#allocation50_spill] sm:$0xff] %v6694_v48  ;;  %v5322_v43 = vpack.i.b16 %v6422_v8, %v6614_v6  ;;  %v1267_v50 = vrot.slane %v1253_v15, %v6116_v28  ;;  %v6719_v2 = vrot.slane %v1270_v22, %v6116_v28  ;;  %v1321_v13 = vcombine.low %v6694_v48, %v6459_v32 }
 0x13d   :  { %5693 = vmatprep.mubr.msk.bf16.mxu1 %vm857_vm3, %v1105_v42  ;;  %v1119_v16 = vrot.slane %v1112_v21, %v6116_v28  ;;  %v1260_v24 = vrot.slane %v1252_v51, %v6116_v28  ;;  %v1279_v62 = vrot.slane %v1269_v45, %v6116_v28  ;;  %v1328_v52 = vrot.slane %v1318_v35, %v6116_v28 }
 0x13e   :  { %v6729_v18 = vrot.slane %v1320_v17, %v6116_v28  ;;  %v1349_v14 = vrot.slane %v1321_v13, %v6116_v28  ;;  %v7815_v22 = vunpack.i.h.s16 %v6558_v55  ;;  %v7816_v44 = vunpack.i.h.s16 %v6231_v63  ;;  %v7818_v13 = vld [vmem:[#allocation13_spill] sm:$0xff] }
 0x13f   :  { %v1535_v21 = vcombine.low %v5319_v7, %v6369_v12  ;;  %v1268_v51 = vcombine.low %v1260_v24, %v1267_v50  ;;  %v1335_v45 = vrot.slane %v1319_v37, %v6116_v28  ;;  %v7817_v35 = vunpack.i.h.s16 %v6203_v46  ;;  %v7819_v7 = vld [vmem:[#allocation17_spill] sm:$0xff] }
 0x140   :  { %v5315_v25 = vpack.i.b16 %v6135_v53, %v7815_v22  ;;  %v5317_v15 = vpack.i.b16 %v6209_v49, %v7816_v44  ;;  %5694 = vmatmul.mubr.msk.bf16.gmra.mrb[8].mxu1 %vm857_vm3, %v1119_v16  ;;  %v1301_v17 = vcombine.low %v1279_v62, %v6719_v2  ;;  %v1351_v55 = vcombine.low %v6729_v18, %v1349_v14 }
 0x141   :  { %v5318_v42 = vpack.i.b16 %v6344_v30, %v7817_v35  ;;  %v1487_v63 = vcombine.low %v6194_v38, %v6218_v56  ;;  %5699 = vmatprep.mubr.msk.bf16.mxu1 %vm857_vm3, %v1268_v51  ;;  %v1350_v12 = vcombine.low %v1328_v52, %v1335_v45  ;;  %v1537_v50 = vcombine.low %v6482_v57, %v5322_v43  ;;  %v7821_v38 = vld [vmem:[#allocation6_spill] sm:$0xff] }
 0x142   :  { %v1488_v22 = vcombine.low %v7818_v13, %v5317_v15  ;;  %v6754_v24 = vcombine.high %v6540_v58, %v6540_v58  ;;  %v7820_v16 = vunpack.i.h.s16 %v6459_v32  ;;  %v1316_v14 = vrot.slane %v1302_v11, %v6116_v28 }
 0x143   :  { %v1489_v37 = vcombine.low %v7819_v7, %v5318_v42  ;;  %v1486_v44 = vcombine.low %v5315_v25, %v7821_v38  ;;  %v7744_v15 = vunpack.i.h.s16 %v6709_v60  ;;  %v1365_v52 = vrot.slane %v1351_v55, %v6116_v28 }
 0x144   :  { %v5325_v62 = vpack.i.b16 %v6709_v60, %v7820_v16  ;;  %v7822_v43 = vunpack.i.h.s16 %v6404_v29  ;;  %v7823_v35 = vunpack.i.h.s16 %v6609_v41  ;;  %v1309_v16 = vrot.slane %v1301_v17, %v6116_v28 }
 0x145   :  { %v1517_v51 = vrot.slane %v1489_v37, %v6116_v28  ;;  %v1503_v11 = vrot.slane %v1487_v63, %v6116_v28  ;;  %v1510_v25 = vrot.slane %v1488_v22, %v6116_v28  ;;  %v6776_v55 = vpack.i.b16 %v6754_v24, %v7744_v15  ;;  %v6786_v63 = vld [vmem:[%s7675_s3 + $0x20] sm:$0xff]  }
 0x146   :  { %v5323_v45 = vpack.i.b16 %v6456_v36, %v7822_v43  ;;  %v5324_v42 = vpack.i.b16 %v6449_v34, %v7823_v35  ;;  %v1544_v37 = vrot.slane %v1535_v21, %v6116_v28  ;;  %v1358_v33 = vrot.slane %v1350_v12, %v6116_v28  ;;  %v7825_v21 = vld [vmem:[#allocation30_spill] sm:$0xff] }
 0x147   :  { %7824 = vst [vmem:[#allocation13_spill] sm:$0xff] %v6776_v55  ;;  %v1558_v43 = vrot.slane %v1537_v50, %v6116_v28  ;;  %v1317_v35 = vcombine.low %v1309_v16, %v1316_v14  ;;  %v1496_v17 = vrot.slane %v1486_v44, %v6116_v28  ;;  %v1519_v56 = vcombine.low %v1510_v25, %v1517_v51  ;;  %v7827_v50 = vld [vmem:[#allocation38_spill] sm:$0xff]  ;;  %v7828_v14 = vld [vmem:[#allocation5_spill] sm:$0xff] }
 0x148   :  { %v1577_v47 = vcombine.low %v5324_v42, %v6516_v61  ;;  %v1578_v22 = vcombine.low %v5325_v62, %v6776_v55  ;;  %v7826_v15 = vcombine.low %v6537_v31, %v7825_v21  ;;  %v1366_v1 = vcombine.low %v1358_v33, %v1365_v52  ;;  %v7831_v31 = vld [vmem:[#allocation18_spill] sm:$0xff] }
 0x149   :  { %v1576_v48 = vcombine.low %v7827_v50, %v5323_v45  ;;  %v7829_v42 = vunpack.i.h.s16 %v7828_v14  ;;  %5700 = vmatmul.mubr.msk.bf16.vlgmr.msra.gmra.mrb[0].mxu1 %vm857_vm3, %v1317_v35  ;;  %v1518_v51 = vcombine.low %v1496_v17, %v1503_v11  ;;  %v649_v25 = vunpack.i.h.s16 %v6754_v24  ;;  %v7833_v11 = vld [vmem:[#allocation26_spill] sm:$0xff] }
 0x14a   :  { %v1551_v12 = vrot.slane %v7826_v15, %v6116_v28  ;;  %v1599_v16 = vrot.slane %v1578_v22, %v6116_v28  ;;  %v7830_v62 = vunpack.i.h.s16 %v6344_v30  ;;  %v7832_v33 = vcombine.low %v7831_v31, %v6277_v40  ;;  %5708 = vmatpush3.bf16.msra.mxu1 %v6672_v19  ;;  %5703 = vmatprep.mubr.msk.bf16.mxu1 %vm857_vm3, %v1366_v1  ;;  %v7834_v17 = vld [vmem:[#allocation34_spill] sm:$0xff] }
 0x14b   :  { %v5335_v44 = vpack.i.b16 %v7829_v42, %v6147_v3  ;;  %v1592_v45 = vrot.slane %v1577_v47, %v6116_v28  ;;  %v6814_v35 = vrot.slane %v7833_v11, %v6116_v28  ;;  %v1559_v22 = vcombine.low %v7834_v17, %v1544_v37  ;;  %5717 = vmatprep.subr.bf16.mxu1 %v6786_v63  ;;  %v7839_v17 = vld [vmem:[#allocation44_spill] sm:$0xff] }
 0x14c   :  { %v5336_v55 = vpack.i.b16 %v7830_v62, %v6197_v39  ;;  %v6807_v15 = vrot.slane %v7832_v33, %v6116_v28  ;;  %v1560_v52 = vcombine.low %v1551_v12, %v1558_v43  ;;  %v1373_v21 = vrot.slane %v6540_v58, %v6116_v28  ;;  %v7835_v43 = vld [vmem:[#allocation21_spill] sm:$0xff] }
 0x14d   :  { %v1533_v40 = vrot.slane %v1519_v56, %v6116_v28  ;;  %v1585_v19 = vrot.slane %v1576_v48, %v6116_v28  ;;  %v1601_v42 = vcombine.low %v1592_v45, %v1599_v16  ;;  %v1733_v1 = vcombine.low %v5335_v44, %v6164_v23  ;;  %v7837_v62 = vld [vmem:[#allocation29_spill] sm:$0xff] }
 0x14e   :  { %v1783_v47 = vcombine.low %v6431_v10, %v6422_v8  ;;  %v7836_v12 = vpack.i.b16 %v6176_v27, %v7835_v43  ;;  %v1526_v31 = vrot.slane %v1518_v51, %v6116_v28  ;;  %v6831_v33 = vpack.i.b16 %v6814_v35, %v649_v25  ;;  %v7838_v16 = vld [vmem:[#allocation45_spill] sm:$0xff] }
 0x14f   :  { %v1735_v56 = vcombine.low %v6203_v46, %v5336_v55  ;;  %v1574_v48 = vrot.slane %v1560_v52, %v6116_v28  ;;  %v1600_v45 = vcombine.low %v1585_v19, %v7838_v16  ;;  %v1732_v44 = vcombine.low %v6135_v53, %v6140_v59 }
 0x150   :  { %v2029_v37 = vcombine.low %v7837_v62, %v7836_v12  ;;  %v6839_v10 = vrot.slane %v1783_v47, %v6116_v28  ;;  %v1567_v11 = vrot.slane %v1559_v22, %v6116_v28  ;;  %v2032_v51 = vcombine.low %v7839_v17, %v7827_v50 }
 0x151   :  { %v1380_v25 = vrot.slane %v1373_v21, %v6116_v28  ;;  %v1734_v55 = vcombine.low %v6173_v26, %v6209_v49  ;;  %v1534_v12 = vcombine.low %v1526_v31, %v1533_v40  ;;  %v1615_v52 = vrot.slane %v1601_v42, %v6116_v28 }
 0x152   :  { %v1749_v19 = vrot.slane %v1733_v1, %v6116_v28  ;;  %v1623_v59 = vrot.slane %v6831_v33, %v6116_v28  ;;  %v1763_v22 = vrot.slane %v1735_v56, %v6116_v28  ;;  %v575_v21 = vunpack.i.h.s16 %v6147_v3  ;;  %v7841_v3 = vld [vmem:[#allocation16_spill] sm:$0xff] }
 0x153   :  { %5704 = vmatmul.mubr.msk.bf16.gmra.mrb[12].mxu1 %vm857_vm3, %v1380_v25  ;;  %v589_v47 = vunpack.i.h.s16 %v6197_v39  ;;  %v1575_v40 = vcombine.low %v1567_v11, %v1574_v48  ;;  %v1608_v42 = vrot.slane %v1600_v45, %v6116_v28  ;;  %v1742_v1 = vrot.slane %v1732_v44, %v6116_v28 }
 0x154   :  { %5709 = vmatprep.mubr.msk.bf16.mxu1 %vm857_vm3, %v1534_v12  ;;  %v7840_v31 = vunpack.i.h.s16 %v6456_v36  ;;  %v1756_v17 = vrot.slane %v1734_v55, %v6116_v28  ;;  %v5348_v25 = vpack.i.b16 %v6164_v23, %v575_v21  ;;  %v1982_v53 = vcombine.low %v7841_v3, %v7819_v7  ;;  %v7843_v55 = vld [vmem:[#allocation27_spill] sm:$0xff] }
 0x155   :  { %v5350_v56 = vpack.i.b16 %v6235_v0, %v589_v47  ;;  %v1616_v26 = vcombine.low %v1608_v42, %v1615_v52  ;;  %v1764_v12 = vcombine.low %v1742_v1, %v1749_v19  ;;  %v7842_v48 = vunpack.i.h.s16 %v6709_v60  ;;  %v7844_v52 = vld [vmem:[#allocation8_spill] sm:$0xff]  ;;  %v7846_v1 = vld [vmem:[#allocation43_spill] sm:$0xff] }
 0x156   :  { %v5338_v16 = vpack.i.b16 %v7840_v31, %v6476_v9  ;;  %v1823_v44 = vcombine.low %v6449_v34, %v6459_v32  ;;  %v1765_v11 = vcombine.low %v1756_v17, %v1763_v22  ;;  %v1981_v31 = vcombine.low %v5348_v25, %v7818_v13  ;;  %v6889_v17 = vld [vmem:[%s7675_s3 + $0x28] sm:$0xff]  }
 0x157   :  { %v5339_v45 = vpack.i.b16 %v7842_v48, %v6540_v58  ;;  %v1983_v39 = vcombine.low %v7843_v55, %v5350_v56  ;;  %v2004_v21 = vrot.slane %v1982_v53, %v6116_v28  ;;  %v7845_v19 = vcombine.low %v7821_v38, %v7844_v52 }
 0x158   :  { %v1822_v47 = vcombine.low %v6404_v29, %v5338_v16  ;;  %v2039_v60 = vrot.slane %v2029_v37, %v6116_v28  ;;  %v7847_v34 = vcombine.low %v7846_v1, %v6482_v57  ;;  %v1997_v53 = vrot.slane %v1981_v31, %v6116_v28 }
 0x159   :  { %v1990_v42 = vrot.slane %v7845_v19, %v6116_v28  ;;  %v2011_v16 = vrot.slane %v1983_v39, %v6116_v28  ;;  %v2060_v25 = vrot.slane %v2032_v51, %v6116_v28  ;;  %v631_v38 = vunpack.i.h.s16 %v6476_v9 }
 0x15a   :  { %v2053_v22 = vrot.slane %v7847_v34, %v6116_v28  ;;  %v1824_v37 = vcombine.low %v5339_v45, %v6754_v24  ;;  %v2061_v56 = vcombine.low %v2039_v60, %v6700_v5  ;;  %v645_v57 = vunpack.i.h.s16 %v6540_v58  ;;  %v7849_v60 = vld [vmem:[#allocation41_spill] sm:$0xff] }
 0x15b   :  { %v7848_v3 = vunpack.i.h.s16 %v6411_v4  ;;  %5710 = vmatmul.mubr.msk.bf16.vlgmr.msra.gmra.mrb[0].mxu1 %vm857_vm3, %v1575_v40  ;;  %v2012_v52 = vcombine.low %v1990_v42, %v1997_v53  ;;  %v2013_v31 = vcombine.low %v2004_v21, %v2011_v16  ;;  %v5355_v39 = vpack.i.b16 %v6444_v54, %v631_v38  ;;  %v7850_v42 = vld [vmem:[#allocation39_spill] sm:$0xff] }
 0x15c   :  { %v2062_v19 = vcombine.low %v2053_v22, %v2060_v25  ;;  %5718 = vmatpush3.bf16.msra.mxu1 %v6786_v63  ;;  %5713 = vmatprep.mubr.msk.bf16.mxu1 %vm857_vm3, %v1616_v26  ;;  %v2069_v51 = vrot.slane %v2061_v56, %v6116_v28  ;;  %v5357_v45 = vpack.i.b16 %v6754_v24, %v645_v57  ;;  %v7859_v25 = vld [vmem:[#allocation22_spill] sm:$0xff] }
 0x15d   :  { %v5356_v48 = vpack.i.b16 %v6609_v41, %v7848_v3  ;;  %5727 = vmatprep.subr.bf16.mxu1 %v6889_v17  ;;  %v6910_v41 = vrot.slane %v2012_v52, %v6116_v28  ;;  %v6913_v40 = vrot.slane %v2013_v31, %v6116_v28  ;;  %v2078_v63 = vcombine.low %v7850_v42, %v5355_v39 }
 0x15e   :  { %v2076_v21 = vrot.slane %v2062_v19, %v6116_v28  ;;  %v1779_v26 = vrot.slane %v1765_v11, %v6116_v28  ;;  %v1845_v34 = vrot.slane %v1824_v37, %v6116_v28  ;;  %v2081_v22 = vcombine.low %v5357_v45, %v6831_v33  ;;  %v7851_v11 = vld [vmem:[#allocation46_spill] sm:$0xff] }
 0x15f   :  { %v2079_v1 = vcombine.low %v7849_v60, %v5356_v48  ;;  %v1772_v16 = vrot.slane %v1764_v12, %v6116_v28  ;;  %v2088_v56 = vrot.slane %v2078_v63, %v6116_v28  ;;  %v1831_v57 = vrot.slane %v1822_v47, %v6116_v28  ;;  %v7853_v12 = vld [vmem:[#allocation31_spill] sm:$0xff] }
 0x160   :  { %v6924_v38 = vcombine.low %v2069_v51, %v2076_v21  ;;  %v1838_v3 = vrot.slane %v1823_v44, %v6116_v28  ;;  %v7852_v37 = vcombine.low %v6516_v61, %v7851_v11  ;;  %v2109_v52 = vrot.slane %v2081_v22, %v6116_v28  ;;  %v7854_v51 = vld [vmem:[#allocation19_spill] sm:$0xff]  ;;  %v7856_v44 = vld [vmem:[#allocation24_spill] sm:$0xff]  ;;  %v7857_v11 = vld [vmem:[#allocation25_spill] sm:$0xff] }
 0x161   :  { %v2095_v53 = vrot.slane %v2079_v1, %v6116_v28  ;;  %v653_v31 = vunpack.i.h.s16 %v7853_v12  ;;  %v1630_v19 = vrot.slane %v1623_v59, %v6116_v28  ;;  %v7855_v45 = vpack.i.b16 %v6614_v6, %v7854_v51 }
 0x162   :  { %v6933_v48 = vrot.slane %v7852_v37, %v6116_v28  ;;  %v1780_v1 = vcombine.low %v1772_v16, %v1779_v26  ;;  %v1805_v21 = vcombine.low %v6719_v2, %v7856_v44  ;;  %v1847_v63 = vcombine.low %v1838_v3, %v1845_v34  ;;  %v7858_v37 = vld [vmem:[#allocation23_spill] sm:$0xff] }
 0x163   :  { %v2110_v39 = vcombine.low %v2088_v56, %v2095_v53  ;;  %v2291_v47 = vcombine.low %v7855_v45, %v6422_v8  ;;  %v2314_v22 = vcombine.low %v7856_v44, %v7857_v11  ;;  %v2534_v9 = vcombine.low %v7859_v25, %v7858_v37  ;;  %5714 = vmatmul.mubr.msk.bf16.gmra.mrb[16].mxu1 %vm857_vm3, %v1630_v19 }
 0x164   :  { %v2111_v61 = vcombine.low %v6933_v48, %v2109_v52  ;;  %v6951_v59 = vcombine.high %v6814_v35, %v6814_v35  ;;  %v2292_v6 = vcombine.low %v6404_v29, %v6456_v36  ;;  %5719 = vmatprep.mubr.msk.bf16.mxu1 %vm857_vm3, %v1780_v1  ;;  %v7860_v2 = vcombine.low %v6807_v15, %v6839_v10  ;;  %v7861_v52 = vld [vmem:[#allocation48_spill] sm:$0xff] }
 0x165   :  { %v1846_v34 = vcombine.low %v1831_v57, %v6729_v18  ;;  %v6963_v53 = vrot.slane %v2110_v39, %v6116_v28  ;;  %v2306_v25 = vrot.slane %v2291_v47, %v6116_v28  ;;  %v5368_v36 = vpack.i.b16 %v653_v31, %v6814_v35 }
 0x166   :  { %v1820_v26 = vrot.slane %v7860_v2, %v6116_v28  ;;  %v6966_v16 = vrot.slane %v2111_v61, %v6116_v28  ;;  %v2313_v56 = vrot.slane %v2292_v6, %v6116_v28  ;;  %v2331_v19 = vcombine.low %v6444_v54, %v7861_v52  ;;  %v6988_v61 = vld [vmem:[%s7675_s3 + $0x30] sm:$0xff]  }
 0x167   :  { %v1813_v15 = vrot.slane %v1805_v21, %v6116_v28  ;;  %v1861_v10 = vrot.slane %v1847_v63, %v6116_v28  ;;  %v5369_v57 = vcombine.high %v6459_v32, %v6540_v58  ;;  %v655_v39 = vunpack.i.h.s16 %v6951_v59 }
 0x168   :  { %v2126_v18 = vcombine.low %v6963_v53, %v6966_v16  ;;  %v2315_v45 = vcombine.low %v2306_v25, %v2313_v56  ;;  %v2333_v47 = vcombine.low %v5368_v36, %v6951_v59  ;;  %v2340_v31 = vrot.slane %v2331_v19, %v6116_v28  ;;  %v7862_v36 = vld [vmem:[#allocation40_spill] sm:$0xff] }
 0x169   :  { %v1821_v1 = vcombine.low %v1813_v15, %v1820_v26  ;;  %v1854_v44 = vrot.slane %v1846_v34, %v6116_v28  ;;  %v651_v21 = vunpack.i.h.s16 %v6814_v35  ;;  %v2322_v63 = vrot.slane %v2314_v22, %v6116_v28 }
 0x16a   :  { %v2329_v11 = vrot.slane %v2315_v45, %v6116_v28  ;;  %v2347_v37 = vrot.slane %v5369_v57, %v6116_v28  ;;  %v2354_v6 = vrot.slane %v2333_v47, %v6116_v28  ;;  %v2355_v2 = vcombine.low %v2340_v31, %v1838_v3  ;;  %v7866_v31 = vld [vmem:[#allocation42_spill] sm:$0xff] }
 0x16b   :  { %v609_v26 = vunpack.i.h.s16 %v7854_v51  ;;  %v1862_v25 = vcombine.low %v1854_v44, %v1861_v10  ;;  %v2543_v34 = vrot.slane %v2534_v9, %v6116_v28  ;;  %5720 = vmatmul.mubr.msk.bf16.vlgmr.msra.gmra.mrb[0].mxu1 %vm857_vm3, %v1821_v1  ;;  %v7863_v52 = vcombine.low %v7850_v42, %v7862_v36  ;;  %v7864_v42 = vld [vmem:[#allocation32_spill] sm:$0xff]  ;;  %v7867_v1 = vld [vmem:[#allocation13_spill] sm:$0xff] }
 0x16c   :  { %v6996_v22 = vcombine.low %v2322_v63, %v2329_v11  ;;  %v2356_v56 = vcombine.low %v2347_v37, %v2354_v6  ;;  %5728 = vmatpush3.bf16.msra.mxu1 %v6889_v17  ;;  %v1869_v3 = vrot.slane %v6814_v35, %v6116_v28  ;;  %v5381_v9 = vpack.i.b16 %v6951_v59, %v651_v21 }
 0x16d   :  { %v2557_v19 = vrot.slane %v7863_v52, %v6116_v28  ;;  %5723 = vmatprep.mubr.msk.bf16.mxu1 %vm857_vm3, %v1862_v25  ;;  %v5380_v51 = vpack.i.b16 %v6422_v8, %v609_v26  ;;  %5737 = vmatprep.subr.bf16.mxu1 %v6988_v61  ;;  %v7010_v15 = vrot.slane %v2355_v2, %v6116_v28  ;;  %v7865_v17 = vunpack.i.h.s16 %v6176_v27 }
 0x16e   :  { %v7013_v10 = vrot.slane %v2356_v56, %v6116_v28  ;;  %v5382_v57 = vpack.i.b16 %v7864_v42, %v655_v39  ;;  %v2575_v8 = vcombine.low %v7849_v60, %v7866_v31  ;;  %v2576_v59 = vcombine.low %v7867_v1, %v6831_v33 }
 0x16f   :  { %v5366_v45 = vpack.i.b16 %v7865_v17, %v6257_v20  ;;  %v2535_v47 = vcombine.low %v5380_v51, %v7827_v50  ;;  %v2558_v37 = vcombine.low %v6700_v5, %v2543_v34  ;;  %v1876_v50 = vrot.slane %v1869_v3, %v6116_v28  ;;  %v7869_v5 = vld [vmem:[#allocation47_spill] sm:$0xff] }
 0x170   :  { %v2371_v44 = vcombine.low %v7010_v15, %v7013_v10  ;;  %v2577_v63 = vcombine.low %v5381_v9, %v5382_v57  ;;  %v2584_v6 = vrot.slane %v2575_v8, %v6116_v28  ;;  %v2591_v2 = vrot.slane %v2576_v59, %v6116_v28  ;;  %v7870_v57 = vld [vmem:[#allocation50_spill] sm:$0xff]  ;;  %v5936_v8 = vld [vmem:[%s7675_s3 + $0x38] sm:$0xff]   ;;  %v7876_v10 = vld [vmem:[#allocation49_spill] sm:$0xff] }
 0x171   :  { %v2550_v11 = vrot.slane %v2535_v47, %v6116_v28  ;;  %v2244_v60 = vcombine.low %v6235_v0, %v5366_v45  ;;  %v7868_v36 = vcombine.low %v6910_v41, %v6913_v40  ;;  %v2242_v34 = vcombine.low %v7869_v5, %v6209_v49 }
 0x172   :  { %v2598_v26 = vrot.slane %v2577_v63, %v6116_v28  ;;  %v2599_v33 = vcombine.low %v2584_v6, %v6933_v48  ;;  %v2243_v52 = vcombine.low %v6203_v46, %v6344_v30  ;;  %v7044_v3 = vrot.slane %v2558_v37, %v6116_v28 }
 0x173   :  { %v2559_v25 = vcombine.low %v2550_v11, %v2557_v19  ;;  %5724 = vmatmul.mubr.msk.bf16.gmra.mrb[20].mxu1 %vm857_vm3, %v1876_v50  ;;  %v5393_v48 = vpack.i.b16 %v655_v39, %v7853_v12  ;;  %v2241_v49 = vcombine.low %v7828_v14, %v6164_v23  ;;  %v2272_v40 = vrot.slane %v2244_v60, %v6116_v28  ;;  %v7872_v60 = vld [vmem:[#allocation15_spill] sm:$0xff] }
 0x174   :  { %v2600_v56 = vcombine.low %v2591_v2, %v2598_v26  ;;  %5729 = vmatprep.mubr.msk.bf16.mxu1 %vm857_vm3, %v7868_v36  ;;  %v7051_v51 = vrot.slane %v2599_v33, %v6116_v28  ;;  %v2826_v39 = vcombine.low %v6411_v4, %v7870_v57  ;;  %v2258_v17 = vrot.slane %v2242_v34, %v6116_v28 }
 0x175   :  { %v7047_v19 = vrot.slane %v2559_v25, %v6116_v28  ;;  %v2265_v45 = vrot.slane %v2243_v52, %v6116_v28  ;;  %v2827_v47 = vcombine.low %v6459_v32, %v6540_v58  ;;  %v2828_v14 = vcombine.low %v6754_v24, %v6814_v35 }
 0x176   :  { %v7054_v41 = vrot.slane %v2600_v56, %v6116_v28  ;;  %v5358_v31 = vpack.i.b16 %v7853_v12, %v651_v21  ;;  %v2829_v1 = vcombine.low %v5393_v48, %v7864_v42  ;;  %v2251_v4 = vrot.slane %v2241_v49, %v6116_v28  ;;  %v7874_v56 = vld [vmem:[#allocation10_spill] sm:$0xff] }
 0x177   :  { %v2574_v30 = vcombine.low %v7044_v3, %v7047_v19  ;;  %v2274_v59 = vcombine.low %v2265_v45, %v2272_v40  ;;  %v2836_v63 = vrot.slane %v2826_v39, %v6116_v28  ;;  %v2843_v11 = vrot.slane %v2827_v47, %v6116_v28  ;;  %v7878_v47 = vld [vmem:[#allocation14_spill] sm:$0xff] }
 0x178   :  { %v2615_v9 = vcombine.low %v7051_v51, %v7054_v41  ;;  %v2850_v32 = vrot.slane %v2828_v14, %v6116_v28  ;;  %v2857_v58 = vrot.slane %v2829_v1, %v6116_v28  ;;  %v2273_v24 = vcombine.low %v2251_v4, %v2258_v17  ;;  %v7879_v14 = vld [vmem:[#allocation36_spill] sm:$0xff] }
 0x179   :  { %v2858_v35 = vcombine.low %v2836_v63, %v2843_v11  ;;  %v2133_v12 = vrot.slane %v5358_v31, %v6116_v28  ;;  %v2288_v37 = vrot.slane %v2274_v59, %v6116_v28  ;;  %v2486_v25 = vcombine.low %v7872_v60, %v7819_v7  ;;  %v7880_v31 = vld [vmem:[#allocation7_spill] sm:$0xff] }
 0x17a   :  { %v2859_v21 = vcombine.low %v2850_v32, %v2857_v58  ;;  %v2281_v53 = vrot.slane %v2273_v24, %v6116_v28  ;;  %v2485_v36 = vcombine.low %v7874_v56, %v7818_v13  ;;  %v7883_v24 = vmov 0.0  }
 0x17b   :  { %5730 = vmatmul.mubr.msk.bf16.vlgmr.msra.gmra.mrb[0].mxu1 %vm857_vm3, %v6924_v38  ;;  %v7871_v38 = vld [vmem:[#allocation20_spill] sm:$0xff]  ;;  %v7093_v2 = vrot.slane %v2858_v35, %v6116_v28  ;;  %v2140_v16 = vrot.slane %v2133_v12, %v6116_v28  ;;  %v2502_v34 = vrot.slane %v2486_v25, %v6116_v28 }
 0x17c   :  { %5738 = vmatpush3.bf16.msra.mxu1 %v6988_v61  ;;  %5733 = vmatprep.mubr.msk.bf16.mxu1 %vm857_vm3, %v2126_v18  ;;  %v5377_v6 = vpack.i.b16 %v7871_v38, %v7835_v43  ;;  %v2873_v61 = vrot.slane %v2859_v21, %v6116_v28  ;;  %v2289_v50 = vcombine.low %v2281_v53, %v2288_v37  ;;  %v7873_v43 = vld [vmem:[#allocation28_spill] sm:$0xff]  ;;  %v7875_v40 = vunpack.i.h.s16 %v7871_v38  ;;  %v5938_v53 = vld [vmem:[%s7677_s5 + $0x8] sm:$0xff]  }
 0x17d   :  { %5747 = vmatprep.subr.bf16.mxu1 %v5936_v8  ;;  %v2487_v33 = vcombine.low %v7843_v55, %v7873_v43  ;;  %v2495_v7 = vrot.slane %v2485_v36, %v6116_v28  ;;  %v2378_v55 = vrot.slane %v7864_v42, %v6116_v28  ;;  %v2729_v42 = vcombine.low %v7876_v10, %v6203_v46  ;;  %v7885_v12 = vld [vmem:[#allocation12_spill] sm:$0xff] }
 0x17e   :  { %v2874_v18 = vcombine.low %v7093_v2, %v2873_v61  ;;  %v2488_v26 = vcombine.low %v7837_v62, %v5377_v6  ;;  %v5937_v62 = vld [vmem:[%s7675_s3 + $0x40] sm:$0xff]   ;;  %v5391_v57 = vpack.i.b16 %v7875_v40, %v6176_v27  ;;  %v5392_v27 = vpack.i.b16 %v7879_v14, %v7878_v47  ;;  %5767 = vmatprep.subr.bf16.mxu0 %v5938_v53 }
 0x17f   :  { %v2509_v52 = vrot.slane %v2487_v33, %v6116_v28  ;;  %v2517_v13 = vcombine.low %v2495_v7, %v2502_v34  ;;  %v7887_v6 = vld [vmem:[#allocation33_spill] sm:$0xff]  ;;  %5768 = vmatpush3.bf16.msra.mxu0 %v5938_v53 }
 0x180   :  { %v2516_v5 = vrot.slane %v2488_v26, %v6116_v28  ;;  %v2731_v15 = vcombine.low %v6257_v20, %v5391_v57  ;;  %v2745_v20 = vrot.slane %v2729_v42, %v6116_v28  ;;  %v2779_v59 = vcombine.low %v5392_v27, %v6404_v29  ;;  %v7882_v29 = vld [vmem:[#allocation35_spill] sm:$0xff] }
 0x181   :  { %v2525_v39 = vrot.slane %v2517_v13, %v6116_v28  ;;  %v2622_v32 = vrot.slane %v7882_v29, %v6116_v28  ;;  %v2881_v2 = vrot.slane %v7887_v6, %v6116_v28 }
 0x182   :  { %v2518_v48 = vcombine.low %v2509_v52, %v2516_v5  ;;  %v2759_v1 = vrot.slane %v2731_v15, %v6116_v28  ;;  %v2801_v58 = vrot.slane %v2779_v59, %v6116_v28 }
 0x183   :  { %5734 = vmatmul.mubr.msk.bf16.gmra.mrb[24].mxu1 %vm857_vm3, %v2140_v16  ;;  %v2888_v61 = vrot.slane %v2881_v2, %v6116_v28 }
 0x184   :  { %5739 = vmatprep.mubr.msk.bf16.mxu1 %vm857_vm3, %v2289_v50  ;;  %v2532_v49 = vrot.slane %v2518_v48, %v6116_v28 }
 0x186   :  { %v2533_v17 = vcombine.low %v2525_v39, %v2532_v49  ;;  %v7184_v49 = vld [vmem:[%s7677_s5] sm:$0xff]  }
 0x187   :  { %5773 = vmatprep.subr.bf16.mxu0 %v7184_v49 }
 0x18b   :  { %5740 = vmatmul.mubr.msk.bf16.vlgmr.msra.gmra.mrb[0].mxu1 %vm857_vm3, %v6996_v22  ;;  %v2385_v22 = vrot.slane %v2378_v55, %v6116_v28 }
 0x18c   :  { %5748 = vmatpush3.bf16.msra.mxu1 %v5936_v8  ;;  %5743 = vmatprep.mubr.msk.bf16.mxu1 %vm857_vm3, %v2371_v44  ;;  %v7877_v44 = vld [vmem:[#allocation9_spill] sm:$0xff]  ;;  %v2728_v8 = vcombine.low %v6164_v23, %v7880_v31 }
 0x18d   :  { %5757 = vmatprep.subr.bf16.mxu1 %v5937_v62  ;;  %v2730_v45 = vcombine.low %v7877_v44, %v6235_v0  ;;  %v7881_v0 = vld [vmem:[#allocation37_spill] sm:$0xff] }
 0x18e   :  { %v2738_v63 = vrot.slane %v2728_v8, %v6116_v28  ;;  %v2780_v11 = vcombine.low %v7881_v0, %v6444_v54 }
 0x18f   :  { %v2752_v4 = vrot.slane %v2730_v45, %v6116_v28 }
 0x190   :  { %v2760_v23 = vcombine.low %v2738_v63, %v2745_v20  ;;  %v2808_v19 = vrot.slane %v2780_v11, %v6116_v28 }
 0x191   :  { %v2761_v46 = vcombine.low %v2752_v4, %v2759_v1 }
 0x192   :  { %v2768_v54 = vrot.slane %v2760_v23, %v6116_v28  ;;  %v2810_v35 = vcombine.low %v2801_v58, %v2808_v19 }
 0x193   :  { %5744 = vmatmul.mubr.msk.bf16.gmra.mrb[28].mxu1 %vm857_vm3, %v2385_v22  ;;  %v2775_v3 = vrot.slane %v2761_v46, %v6116_v28 }
 0x194   :  { %5749 = vmatprep.mubr.msk.bf16.mxu1 %vm857_vm3, %v2533_v17  ;;  %v2824_v41 = vrot.slane %v2810_v35, %v6116_v28 }
 0x195   :  { %v2776_v51 = vcombine.low %v2768_v54, %v2775_v3 }
 0x19b   :  { %5750 = vmatmul.mubr.msk.bf16.vlgmr.msra.gmra.mrb[0].mxu1 %vm857_vm3, %v2574_v30  ;;  %v2629_v30 = vrot.slane %v2622_v32, %v6116_v28 }
 0x19c   :  { %5758 = vmatpush3.bf16.msra.mxu1 %v5937_v62  ;;  %5753 = vmatprep.mubr.msk.bf16.mxu1 %vm857_vm3, %v2615_v9  ;;  %v7884_v9 = vld [vmem:[#allocation11_spill] sm:$0xff] }
 0x19d   :  { %5833 = vmatprep.subr.bf16.mxu1 %v7883_v24  ;;  %v7886_v21 = vcombine.low %v7884_v9, %v7885_v12  ;;  %v5400_v12 = vld [vmem:[%s7676_s4] ss:$0 sm:$0xff] }
 0x19f   :  { %v2817_v37 = vrot.slane %v7886_v21, %v6116_v28 }
 0x1a1   :  { %v2825_v38 = vcombine.low %v2817_v37, %v2824_v41 }
 0x1a3   :  { %5754 = vmatmul.mubr.msk.bf16.gmra.mrb[32].mxu1 %vm857_vm3, %v2629_v30 }
 0x1a4   :  { %5759 = vmatprep.mubr.msk.bf16.mxu1 %vm857_vm3, %v2776_v51 }
 0x1ab   :  { %5760 = vmatmul.mubr.msk.bf16.vlgmr.msra.gmra.mrb[0].mxu1 %vm857_vm3, %v2825_v38 }
 0x1ac   :  { %5763 = vmatprep.mubr.msk.bf16.mxu1 %vm857_vm3, %v2874_v18 }
 0x1b3   :  { %5764 = vmatmul.mubr.msk.bf16.gmra.mrb[36].mxu1 %vm857_vm3, %v2888_v61 }
 0x1b4   :  { %5835 = vmatprep.mubr.msk.bf16.mxu1 %vm5983_vm0, %v7883_v24 }
 0x203   :  { %v5685_v16 = vpop.f32.mrb[4].mxu1 }
 0x204   :  { %v920_v50 = vpop.f32.mrb[5].mxu1 }
 0x205   :  { %v5686_v26 = vpop.f32.mrb[6].mxu1 }
 0x206   :  { %v923_v18 = vpop.f32.mrb[7].mxu1 }
 0x213   :  { %v5695_v60 = vpop.f32.mrb[8].mxu1 }
 0x214   :  { %v1197_v25 = vadd.f32 %v5695_v60, %v5685_v16  ;;  %v1188_v43 = vpop.f32.mrb[9].mxu1 }
 0x215   :  { %v1189_v33 = vadd.f32 %v1188_v43, %v920_v50  ;;  %v5696_v56 = vpop.f32.mrb[10].mxu1 }
 0x216   :  { %v1191_v36 = vpop.f32.mrb[11].mxu1 }
 0x217   :  { %v1192_v5 = vadd.f32 %v1191_v36, %v923_v18 }
 0x226   :  { %v5705_v34 = vpop.f32.mrb[12].mxu1 }
 0x227   :  { %v1469_v52 = vadd.f32 %v5705_v34, %v1197_v25  ;;  %v1449_v62 = vpop.f32.mrb[13].mxu1 }
 0x228   :  { %v1467_v7 = vadd.f32 %v1449_v62, %v1189_v33  ;;  %v5706_v48 = vpop.f32.mrb[14].mxu1 }
 0x229   :  { %v1452_v13 = vpop.f32.mrb[15].mxu1 }
 0x22a   :  { %v1468_v55 = vadd.f32 %v1452_v13, %v1192_v5 }
 0x236   :  { %v5715_v40 = vpop.f32.mrb[16].mxu1 }
 0x237   :  { %v1719_v57 = vadd.f32 %v5715_v40, %v1469_v52  ;;  %v1699_v39 = vpop.f32.mrb[17].mxu1 }
 0x238   :  { %v1717_v22 = vadd.f32 %v1699_v39, %v1467_v7  ;;  %v5716_v17 = vpop.f32.mrb[18].mxu1 }
 0x239   :  { %v1702_v15 = vpop.f32.mrb[19].mxu1 }
 0x23a   :  { %v1718_v10 = vadd.f32 %v1702_v15, %v1468_v55 }
 0x246   :  { %v5725_v42 = vpop.f32.mrb[20].mxu1 }
 0x247   :  { %v1965_v44 = vadd.f32 %v5725_v42, %v1719_v57  ;;  %v1945_v45 = vpop.f32.mrb[21].mxu1 }
 0x248   :  { %v1963_v47 = vadd.f32 %v1945_v45, %v1717_v22  ;;  %v5726_v14 = vpop.f32.mrb[22].mxu1 }
 0x249   :  { %v1948_v27 = vpop.f32.mrb[23].mxu1 }
 0x24a   :  { %v1964_v31 = vadd.f32 %v1948_v27, %v1718_v10 }
 0x256   :  { %v5735_v8 = vpop.f32.mrb[24].mxu1 }
 0x257   :  { %v2229_v1 = vadd.f32 %v5735_v8, %v1965_v44  ;;  %v2209_v20 = vpop.f32.mrb[25].mxu1 }
 0x258   :  { %v2227_v4 = vadd.f32 %v2209_v20, %v1963_v47  ;;  %v5736_v59 = vpop.f32.mrb[26].mxu1 }
 0x259   :  { %v2212_v63 = vpop.f32.mrb[27].mxu1 }
 0x25a   :  { %v2228_v46 = vadd.f32 %v2212_v63, %v1964_v31 }
 0x266   :  { %v5745_v0 = vpop.f32.mrb[28].mxu1 }
 0x267   :  { %v2474_v11 = vadd.f32 %v5745_v0, %v2229_v1  ;;  %v2454_v23 = vpop.f32.mrb[29].mxu1 }
 0x268   :  { %v2472_v29 = vadd.f32 %v2454_v23, %v2227_v4  ;;  %v5746_v32 = vpop.f32.mrb[30].mxu1 }
 0x269   :  { %v2457_v58 = vpop.f32.mrb[31].mxu1 }
 0x26a   :  { %v2473_v3 = vadd.f32 %v2457_v58, %v2228_v46 }
 0x276   :  { %v5755_v19 = vpop.f32.mrb[32].mxu1 }
 0x277   :  { %v2718_v54 = vadd.f32 %v5755_v19, %v2474_v11  ;;  %v2698_v30 = vpop.f32.mrb[33].mxu1 }
 0x278   :  { %v2716_v35 = vadd.f32 %v2698_v30, %v2472_v29  ;;  %v5756_v51 = vpop.f32.mrb[34].mxu1 }
 0x279   :  { %v2701_v41 = vpop.f32.mrb[35].mxu1 }
 0x27a   :  { %v2717_v9 = vadd.f32 %v2701_v41, %v2473_v3 }
 0x27e   :  { %v5761_v21 = vpop.f32.mrb[0].mxu1 }
 0x27f   :  { %v2987_v37 = vadd.f32 %v5761_v21, %v5400_v12  ;;  %v2941_v38 = vpop.f32.mrb[1].mxu1 }
 0x280   :  { %v2985_v6 = vadd.f32 %v5400_v12, %v2941_v38  ;;  %v5762_v2 = vpop.f32.mrb[2].mxu1 }
 0x281   :  { %v2988_v61 = vadd.f32 %v5762_v2, %v5400_v12  ;;  %v2944_v53 = vpop.f32.mrb[3].mxu1  ;;  %v2994_v50 = vmax.f32 %v2987_v37, 0.0 }
 0x282   :  { %v2986_v16 = vadd.f32 %v5400_v12, %v2944_v53  ;;  %v2992_v18 = vmax.f32 %v2985_v6, 0.0 }
 0x283   :  { %v2995_v26 = vmax.f32 %v2988_v61, 0.0 }
 0x284   :  { %v2993_v60 = vmax.f32 %v2986_v16, 0.0 }
 0x285   :  { %v3000_v25 = vpack.c.bf16 %v2995_v26, %v2994_v50  ;;  %v5402_v43 = vpack.c.bf16 %v2995_v26, %v2995_v26 }
 0x286   :  { %v2999_v33 = vpack.c.bf16 %v2993_v60, %v2992_v18  ;;  %v5401_v56 = vpack.c.bf16 %v2993_v60, %v2993_v60  ;;  %v5765_v36 = vpop.f32.mrb[36].mxu1 }
 0x287   :  { %v7191_v5 = vrot.slane %v3000_v25, %v6116_v28  ;;  %v3070_v34 = vrot.slane %v5402_v43, %v6116_v28  ;;  %v2977_v52 = vadd.f32 %v5765_v36, %v2718_v54  ;;  %v2957_v62 = vpop.f32.mrb[37].mxu1 }
 0x288   :  { %v3014_v7 = vrot.slane %v2999_v33, %v6116_v28  ;;  %v3021_v48 = vrot.slane %v5401_v56, %v6116_v28  ;;  %v2975_v13 = vadd.f32 %v2957_v62, %v2716_v35  ;;  %v5766_v55 = vpop.f32.mrb[38].mxu1 }
 0x289   :  { %v3071_v40 = vcombine.high %v7191_v5, %v7191_v5  ;;  %v3072_v57 = vcombine.high %v3070_v34, %v3070_v34  ;;  %v7199_v39 = vrot.slane %v3070_v34, %v6116_v28  ;;  %v2960_v22 = vpop.f32.mrb[39].mxu1  ;;  %v2991_v0 = vadd.f32 %v5400_v12, %v2977_v52 }
 0x28a   :  { %v3022_v17 = vcombine.high %v3014_v7, %v3014_v7  ;;  %v3023_v15 = vcombine.high %v3021_v48, %v3021_v48  ;;  %v3030_v10 = vrot.slane %v3014_v7, %v6116_v28  ;;  %v7203_v42 = vrot.slane %v3021_v48, %v6116_v28 }
 0x28b   :  { %v7206_v44 = vrot.slane %v3072_v57, %v6116_v28  ;;  %v7213_v27 = vrot.slane %v3071_v40, %v6116_v28  ;;  %v7222_v1 = vcombine.high %v7199_v39, %v7199_v39  ;;  %v3193_v63 = vunpack.i.h.s16 %v7199_v39 }
 0x28c   :  { %v3044_v45 = vrot.slane %v3022_v17, %v6116_v28  ;;  %v7210_v47 = vrot.slane %v3023_v15, %v6116_v28  ;;  %v3052_v14 = vcombine.high %v3030_v10, %v3030_v10  ;;  %v7218_v8 = vcombine.high %v7203_v42, %v7203_v42 }
 0x28d   :  { %v3195_v31 = vunpack.i.h.s16 %v7206_v44  ;;  %v3169_v4 = vunpack.i.h.s16 %v3030_v10  ;;  %v2989_v11 = vadd.f32 %v5400_v12, %v2975_v13  ;;  %v7230_v23 = vcombine.high %v7206_v44, %v7206_v44 }
 0x28e   :  { %v7224_v20 = vcombine.high %v3044_v45, %v3044_v45  ;;  %v3173_v59 = vunpack.i.h.s16 %v3052_v14  ;;  %v3179_v46 = vunpack.i.h.s16 %v7210_v47  ;;  %v2976_v58 = vadd.f32 %v2960_v22, %v2717_v9 }
 0x28f   :  { %v5411_v3 = vpack.i.b16 %v7222_v1, %v3195_v31  ;;  %v2998_v19 = vmax.f32 %v2991_v0, 0.0  ;;  %v3171_v54 = vunpack.i.h.s16 %v3044_v45  ;;  %v7237_v30 = vunpack.i.h.s16 %v7218_v8 }
 0x290   :  { %v7233_v29 = vunpack.i.h.s16 %v7224_v20  ;;  %v5418_v32 = vpack.i.b16 %v3173_v59, %v3044_v45  ;;  %v5406_v35 = vpack.i.b16 %v3044_v45, %v3169_v4  ;;  %v2996_v41 = vmax.f32 %v2989_v11, 0.0 }
 0x291   :  { %v2990_v21 = vadd.f32 %v5400_v12, %v2976_v58  ;;  %v3002_v37 = vpack.c.bf16 %v2998_v19, %v2998_v19  ;;  %v5407_v38 = vpack.i.b16 %v7224_v20, %v3171_v54  ;;  %v7247_v9 = vpack.i.b16 %v7218_v8, %v3179_v46 }
 0x292   :  { %v3364_v51 = vcombine.low %v3030_v10, %v5418_v32  ;;  %v7242_v6 = vpack.i.b16 %v7203_v42, %v7233_v29  ;;  %v5410_v61 = vpack.i.b16 %v7206_v44, %v7237_v30  ;;  %v5419_v53 = vpack.i.b16 %v3193_v63, %v7218_v8 }
 0x293   :  { %v2997_v2 = vmax.f32 %v2990_v21, 0.0  ;;  %v3365_v12 = vcombine.low %v7224_v20, %v7210_v47  ;;  %v7256_v16 = vcombine.high %v7210_v47, %v7210_v47  ;;  %v3232_v50 = vcombine.low %v5406_v35, %v5407_v38 }
 0x294   :  { %v3233_v26 = vcombine.low %v7242_v6, %v7247_v9  ;;  %v3374_v18 = vrot.slane %v3364_v51, %v6116_v28  ;;  %v3234_v43 = vcombine.low %v5410_v61, %v5411_v3  ;;  %v3366_v33 = vcombine.low %v5419_v53, %v7206_v44 }
 0x295   :  { %v3001_v60 = vpack.c.bf16 %v2997_v2, %v2996_v41  ;;  %v5403_v25 = vpack.c.bf16 %v2997_v2, %v2997_v2  ;;  %v5426_v56 = vpack.i.b16 %v7233_v29, %v3052_v14  ;;  %v3242_v36 = vrot.slane %v3232_v50, %v6116_v28 }
 0x296   :  { %v3249_v34 = vrot.slane %v3233_v26, %v6116_v28  ;;  %v3381_v52 = vrot.slane %v3365_v12, %v6116_v28  ;;  %v3160_v62 = vrot.slane %v3002_v37, %v6116_v28  ;;  %v5427_v40 = vpack.i.b16 %v3195_v31, %v7256_v16 }
 0x297   :  { %v3112_v7 = vrot.slane %v3001_v60, %v6116_v28  ;;  %v3119_v48 = vrot.slane %v5403_v25, %v6116_v28  ;;  %v7275_v17 = vrot.slane %v7191_v5, %v6116_v28  ;;  %v7279_v15 = vcombine.high %v7213_v27, %v7213_v27 }
 0x298   :  { %v3264_v13 = vcombine.low %v3242_v36, %v3249_v34  ;;  %v3396_v55 = vcombine.low %v3374_v18, %v3381_v52  ;;  %v3199_v10 = vunpack.i.h.s16 %v7230_v23  ;;  %v3499_v44 = vcombine.low %v3044_v45, %v5426_v56 }
 0x299   :  { %v3120_v57 = vcombine.high %v3112_v7, %v3112_v7  ;;  %v7271_v22 = vrot.slane %v3112_v7, %v6116_v28  ;;  %v5434_v14 = vpack.i.b16 %v7224_v20, %v3173_v59  ;;  %v7284_v4 = vrot.slane %v3160_v62, %v6116_v28 }
 0x29a   :  { %v3121_v5 = vcombine.high %v3119_v48, %v3119_v48  ;;  %v3500_v45 = vcombine.low %v7203_v42, %v7218_v8  ;;  %v7300_v59 = vrot.slane %v3119_v48, %v6116_v28  ;;  %v3501_v54 = vcombine.low %v5427_v40, %v7222_v1 }
 0x29b   :  { %v7287_v31 = vrot.slane %v3120_v57, %v6116_v28  ;;  %v7291_v63 = vcombine.high %v7271_v22, %v7271_v22  ;;  %v3201_v0 = vunpack.i.h.s16 %v7271_v22  ;;  %v5412_v11 = vpack.i.b16 %v7271_v22, %v3199_v10 }
 0x29c   :  { %v3509_v35 = vrot.slane %v3499_v44, %v6116_v28  ;;  %v3516_v51 = vrot.slane %v3500_v45, %v6116_v28  ;;  %v3256_v21 = vrot.slane %v3234_v43, %v6116_v28  ;;  %v3388_v61 = vrot.slane %v3366_v33, %v6116_v28 }
 0x29d   :  { %v7304_v32 = vcombine.high %v7287_v31, %v7287_v31  ;;  %v7307_v58 = vunpack.i.h.s16 %v7287_v31  ;;  %v7310_v3 = vunpack.i.h.s16 %v7291_v63  ;;  %v5413_v19 = vpack.i.b16 %v7291_v63, %v3201_v0 }
 0x29e   :  { %v3531_v53 = vcombine.low %v3509_v35, %v3516_v51  ;;  %v3272_v12 = vrot.slane %v3264_v13, %v6116_v28  ;;  %v3404_v26 = vrot.slane %v3396_v55, %v6116_v28  ;;  %v3183_v18 = vunpack.i.h.s16 %v7256_v16 }
 0x29f   :  { %v5439_v41 = vpack.i.b16 %v7300_v59, %v7310_v3  ;;  %v7323_v37 = vpack.i.b16 %v7304_v32, %v7310_v3  ;;  %v5420_v38 = vpack.i.b16 %v7307_v58, %v7271_v22  ;;  %v3235_v2 = vcombine.low %v5412_v11, %v5413_v19 }
 0x2a0   :  { %v5428_v1 = vpack.i.b16 %v7310_v3, %v7287_v31  ;;  %v7335_v60 = vrot.slane %v3121_v5, %v6116_v28  ;;  %v7340_v33 = vunpack.i.h.s16 %v7275_v17  ;;  %v3523_v34 = vrot.slane %v3501_v54, %v6116_v28 }
 0x2a1   :  { %v3367_v50 = vcombine.low %v7230_v23, %v5420_v38  ;;  %v3263_v25 = vrot.slane %v3235_v2, %v6116_v28  ;;  %v3287_v56 = vrot.slane %v7323_v37, %v6116_v28  ;;  %v5435_v52 = vpack.i.b16 %v7210_v47, %v7233_v29 }
 0x2a2   :  { %v3502_v43 = vcombine.low %v7271_v22, %v5428_v1  ;;  %v5436_v48 = vpack.i.b16 %v7275_v17, %v3183_v18  ;;  %v5437_v13 = vpack.i.b16 %v7230_v23, %v7340_v33  ;;  %v3209_v55 = vunpack.i.h.s16 %v7300_v59 }
 0x2a3   :  { %v3395_v36 = vrot.slane %v3367_v50, %v6116_v28  ;;  %v3265_v62 = vcombine.low %v3256_v21, %v3263_v25  ;;  %v5438_v57 = vpack.i.b16 %v7291_v63, %v7307_v58  ;;  %v3635_v44 = vcombine.low %v5434_v14, %v5435_v52  ;;  %v5940_v50 = vld [vmem:[%s7677_s5 + $0x10] sm:$0xff]  }
 0x2a4   :  { %v3530_v7 = vrot.slane %v3502_v43, %v6116_v28  ;;  %v3636_v45 = vcombine.low %v7247_v9, %v5436_v48  ;;  %v3637_v19 = vcombine.low %v5437_v13, %v5412_v11  ;;  %v3539_v35 = vrot.slane %v3531_v53, %v6116_v28 }
 0x2a5   :  { %v3397_v40 = vcombine.low %v3388_v61, %v3395_v36  ;;  %v3279_v5 = vrot.slane %v3265_v62, %v6116_v28  ;;  %v3638_v51 = vcombine.low %v5438_v57, %v5439_v41  ;;  %v3645_v21 = vrot.slane %v3635_v44, %v6116_v28 }
 0x2a6   :  { %v3532_v29 = vcombine.low %v3523_v34, %v3530_v7  ;;  %v3294_v2 = vrot.slane %v3287_v56, %v6116_v28  ;;  %v3652_v14 = vrot.slane %v3636_v45, %v6116_v28  ;;  %v3659_v11 = vrot.slane %v3637_v19, %v6116_v28 }
 0x2a7   :  { %v3411_v54 = vrot.slane %v3397_v40, %v6116_v28  ;;  %v3280_v38 = vcombine.low %v3272_v12, %v3279_v5  ;;  %v3666_v25 = vrot.slane %v3638_v51, %v6116_v28  ;;  %v5446_v41 = vpack.i.b16 %v3179_v46, %v7203_v42 }
 0x2a8   :  { %v3546_v61 = vrot.slane %v3532_v29, %v6116_v28  ;;  %v3667_v12 = vcombine.low %v3645_v21, %v3652_v14  ;;  %v5448_v43 = vpack.i.b16 %v3209_v55, %v7304_v32  ;;  %v7382_v56 = vcombine.high %v7300_v59, %v7300_v59 }
 0x2a9   :  { %v3412_v1 = vcombine.low %v3404_v26, %v3411_v54  ;;  %5769 = vmatprep.mubr.msk.bf16.mxu0 %vm857_vm3, %v3280_v38  ;;  %v5447_v26 = vpack.i.b16 %v3199_v10, %v7213_v27  ;;  %v3668_v36 = vcombine.low %v3659_v11, %v3666_v25  ;;  %v3769_v46 = vcombine.low %v7224_v20, %v5446_v41  ;;  %v5941_v38 = vld [vmem:[%s7677_s5 + $0x18] sm:$0xff]  }
 0x2aa   :  { %v3547_v53 = vcombine.low %v3539_v35, %v3546_v61  ;;  %5770 = vmatmul.mubr.msk.bf16.vlgmr.msra.gmra.mrb[28].mxu0 %vm857_vm3, %v3294_v2  ;;  %v3770_v34 = vcombine.low %v7218_v8, %v7275_v17  ;;  %v3419_v23 = vrot.slane %v7291_v63, %v6116_v28  ;;  %v3772_v52 = vcombine.low %v7291_v63, %v5448_v43 }
 0x2ab   :  { %5774 = vmatpush3.bf16.msra.mxu0 %v7184_v49  ;;  %5775 = vmatprep.mubr.msk.bf16.mxu0 %vm857_vm3, %v3412_v1  ;;  %v3771_v10 = vcombine.low %v5447_v26, %v7271_v22  ;;  %v3177_v62 = vunpack.i.h.s16 %v7203_v42  ;;  %v3675_v7 = vrot.slane %v3667_v12, %v6116_v28  ;;  %v3682_v20 = vrot.slane %v3668_v36, %v6116_v28 }
 0x2ac   :  { %5779 = vmatprep.subr.bf16.mxu0 %v5940_v50  ;;  %v3779_v48 = vrot.slane %v3769_v46, %v6116_v28  ;;  %v3786_v49 = vrot.slane %v3770_v34, %v6116_v28  ;;  %v3800_v40 = vrot.slane %v3772_v52, %v6116_v28  ;;  %v3187_v57 = vunpack.i.h.s16 %v7213_v27 }
 0x2ad   :  { %v3793_v13 = vrot.slane %v3771_v10, %v6116_v28  ;;  %v3207_v44 = vunpack.i.h.s16 %v7304_v32  ;;  %v3683_v5 = vcombine.low %v3675_v7, %v3682_v20  ;;  %v5454_v42 = vpack.i.b16 %v7218_v8, %v3177_v62 }
 0x2ae   :  { %v3801_v29 = vcombine.low %v3779_v48, %v3786_v49  ;;  %v5455_v45 = vpack.i.b16 %v7256_v16, %v7237_v30  ;;  %v7408_v54 = vpack.i.b16 %v7213_v27, %v7340_v33  ;;  %v5457_v35 = vpack.i.b16 %v7271_v22, %v3187_v57 }
 0x2af   :  { %v3802_v19 = vcombine.low %v3793_v13, %v3800_v40  ;;  %v5458_v51 = vpack.i.b16 %v7287_v31, %v3201_v0  ;;  %v3426_v21 = vrot.slane %v3419_v23, %v6116_v28  ;;  %v5459_v61 = vpack.i.b16 %v7335_v60, %v3207_v44  ;;  %v5942_v40 = vld [vmem:[%s7677_s5 + $0x20] sm:$0xff]  }
 0x2b0   :  { %v7419_v2 = vrot.slane %v3801_v29, %v6116_v28  ;;  %v3905_v14 = vcombine.low %v7242_v6, %v5454_v42  ;;  %v3906_v22 = vcombine.low %v5455_v45, %v7408_v54  ;;  %v3101_v31 = vcombine.high %v7275_v17, %v7275_v17 }
 0x2b1   :  { %v7424_v1 = vrot.slane %v3802_v19, %v6116_v28  ;;  %v3907_v11 = vcombine.low %v5457_v35, %v5458_v51  ;;  %v3554_v0 = vrot.slane %v7304_v32, %v6116_v28  ;;  %v3908_v25 = vcombine.low %v7323_v37, %v5459_v61 }
 0x2b2   :  { %5776 = vmatmul.mubr.msk.bf16.vlgmr.msra.gmra.mrb[32].mxu0 %vm857_vm3, %v3426_v21  ;;  %v3915_v41 = vrot.slane %v3905_v14, %v6116_v28  ;;  %v3213_v6 = vunpack.i.h.s16 %v7382_v56  ;;  %v5440_v12 = vpack.i.b16 %v7335_v60, %v3209_v55  ;;  %v3922_v43 = vrot.slane %v3906_v22, %v6116_v28 }
 0x2b3   :  { %5780 = vmatpush3.bf16.msra.mxu0 %v5940_v50  ;;  %5781 = vmatprep.mubr.msk.bf16.mxu0 %vm857_vm3, %v3547_v53  ;;  %v3817_v26 = vcombine.low %v7419_v2, %v7424_v1  ;;  %v3211_v36 = vunpack.i.h.s16 %v7335_v60  ;;  %v3929_v46 = vrot.slane %v3907_v11, %v6116_v28  ;;  %v3936_v34 = vrot.slane %v3908_v25, %v6116_v28 }
 0x2b4   :  { %5785 = vmatprep.subr.bf16.mxu0 %v5941_v38  ;;  %v5466_v50 = vpack.i.b16 %v3183_v18, %v7218_v8  ;;  %v5467_v53 = vpack.i.b16 %v7307_v58, %v7279_v15  ;;  %v3937_v55 = vcombine.low %v3915_v41, %v3922_v43  ;;  %v5468_v23 = vpack.i.b16 %v3213_v6, %v7335_v60 }
 0x2b5   :  { %v4041_v10 = vcombine.low %v7275_v17, %v3101_v31  ;;  %v3189_v52 = vunpack.i.h.s16 %v3101_v31  ;;  %v3938_v62 = vcombine.low %v3929_v46, %v3936_v34  ;;  %v7456_v48 = vcombine.high %v7335_v60, %v7335_v60  ;;  %v5943_v46 = vld [vmem:[%s7677_s5 + $0x28] sm:$0xff]  }
 0x2b6   :  { %v4040_v7 = vcombine.low %v7210_v47, %v5466_v50  ;;  %v4042_v20 = vcombine.low %v5467_v53, %v7291_v63  ;;  %v3561_v18 = vrot.slane %v3554_v0, %v6116_v28  ;;  %v3945_v49 = vrot.slane %v3937_v55, %v6116_v28 }
 0x2b7   :  { %v4043_v58 = vcombine.low %v7300_v59, %v5468_v23  ;;  %v4057_v13 = vrot.slane %v4041_v10, %v6116_v28  ;;  %v3952_v47 = vrot.slane %v3938_v62, %v6116_v28  ;;  %v3191_v29 = vunpack.i.h.s16 %v7279_v15 }
 0x2b8   :  { %v4050_v57 = vrot.slane %v4040_v7, %v6116_v28  ;;  %v4064_v44 = vrot.slane %v4042_v20, %v6116_v28  ;;  %v3690_v42 = vrot.slane %v5440_v12, %v6116_v28  ;;  %v5474_v59 = vpack.i.b16 %v7275_v17, %v7237_v30 }
 0x2b9   :  { %v4071_v45 = vrot.slane %v4043_v58, %v6116_v28  ;;  %v5475_v19 = vpack.i.b16 %v7279_v15, %v3189_v52  ;;  %v3953_v35 = vcombine.low %v3945_v49, %v3952_v47  ;;  %v5476_v21 = vpack.i.b16 %v7291_v63, %v3191_v29  ;;  %v5944_v49 = vld [vmem:[%s7677_s5 + $0x30] sm:$0xff]  }
 0x2ba   :  { %5782 = vmatmul.mubr.msk.bf16.vlgmr.msra.gmra.mrb[36].mxu0 %vm857_vm3, %v3561_v18  ;;  %v4072_v51 = vcombine.low %v4050_v57, %v4057_v13  ;;  %v5477_v61 = vpack.i.b16 %v7456_v48, %v3211_v36  ;;  %v4174_v22 = vcombine.low %v7247_v9, %v5474_v59  ;;  %v3215_v17 = vunpack.i.h.s16 %v7456_v48  ;;  %v5945_v13 = vld [vmem:[%s7677_s5 + $0x38] sm:$0xff]   ;;  %v5948_v29 = vld [vmem:[%s7679_s7 + $0x10] sm:$0xff]  }
 0x2bb   :  { %5786 = vmatpush3.bf16.msra.mxu0 %v5941_v38  ;;  %5787 = vmatprep.mubr.msk.bf16.mxu0 %vm857_vm3, %v3683_v5  ;;  %v4073_v14 = vcombine.low %v4064_v44, %v4071_v45  ;;  %v4175_v30 = vcombine.low %v7408_v54, %v5475_v19  ;;  %v4176_v31 = vcombine.low %v5476_v21, %v7323_v37  ;;  %v5947_v44 = vld [vmem:[%s7679_s7 + $0x8] sm:$0xff]  }
 0x2bc   :  { %5791 = vmatprep.subr.bf16.mxu0 %v5942_v40  ;;  %v4080_v11 = vrot.slane %v4072_v51, %v6116_v28  ;;  %v4177_v63 = vcombine.low %v5440_v12, %v5477_v61  ;;  %v5484_v0 = vpack.i.b16 %v7340_v33, %v7256_v16  ;;  %v4184_v5 = vrot.slane %v4174_v22, %v6116_v28 }
 0x2bd   :  { %v4087_v38 = vrot.slane %v4073_v14, %v6116_v28  ;;  %v4191_v25 = vrot.slane %v4175_v30, %v6116_v28  ;;  %v5478_v9 = vpack.i.b16 %v7284_v4, %v3215_v17  ;;  %v4198_v54 = vrot.slane %v4176_v31, %v6116_v28  ;;  %5834 = vmatpush3.bf16.msra.mxu1 %v5948_v29 }
 0x2be   :  { %v4205_v41 = vrot.slane %v4177_v63, %v6116_v28  ;;  %v5485_v6 = vpack.i.b16 %v7310_v3, %v7199_v39  ;;  %v5486_v37 = vpack.i.b16 %v3215_v17, %v7382_v56  ;;  %v3697_v12 = vrot.slane %v3690_v42, %v6116_v28  ;;  %5845 = vmatprep.subr.bf16.mxu1 %v7883_v24 }
 0x2bf   :  { %v4088_v16 = vcombine.low %v4080_v11, %v4087_v38  ;;  %v4206_v33 = vcombine.low %v4184_v5, %v4191_v25  ;;  %v4309_v43 = vcombine.low %v7218_v8, %v5484_v0  ;;  %v4310_v50 = vcombine.low %v7213_v27, %v7279_v15 }
 0x2c0   :  { %v4207_v34 = vcombine.low %v4198_v54, %v4205_v41  ;;  %v4311_v53 = vcombine.low %v5485_v6, %v7304_v32  ;;  %v4312_v39 = vcombine.low %v7335_v60, %v5486_v37  ;;  %v3824_v27 = vrot.slane %v7335_v60, %v6116_v28 }
 0x2c1   :  { %v4214_v3 = vrot.slane %v4206_v33, %v6116_v28  ;;  %v4319_v55 = vrot.slane %v4309_v43, %v6116_v28  ;;  %v4326_v23 = vrot.slane %v4310_v50, %v6116_v28  ;;  %v5460_v2 = vpack.i.b16 %v7382_v56, %v3211_v36  ;;  %v5946_v36 = vld [vmem:[%s7677_s5 + $0x40] sm:$0xff]   ;;  %s5985_s5 = smov [#allocation2]  }
 0x2c2   :  { %5788 = vmatmul.mubr.msk.bf16.vlgmr.msra.gmra.mrb[40].mxu0 %vm857_vm3, %v3697_v12  ;;  %v4221_v8 = vrot.slane %v4207_v34, %v6116_v28  ;;  %v4333_v10 = vrot.slane %v4311_v53, %v6116_v28  ;;  %v4340_v52 = vrot.slane %v4312_v39, %v6116_v28  ;;  %v3831_v18 = vrot.slane %v3824_v27, %v6116_v28  ;;  %s5226_s30 = sshll.u32 %s5985_s5, 4  ;;  %s5227_s30 = int_to_ptr.vmem [resolvable:$true] %s5226_s30 }
 0x2c3   :  { %5792 = vmatpush3.bf16.msra.mxu0 %v5942_v40  ;;  %5793 = vmatprep.mubr.msk.bf16.mxu0 %vm857_vm3, %v3817_v26  ;;  %v4341_v32 = vcombine.low %v4319_v55, %v4326_v23  ;;  %v3960_v26 = vrot.slane %v5460_v2, %v6116_v28  ;;  %v4095_v60 = vrot.slane %v7456_v48, %v6116_v28  ;;  %p5963_p1 = scmp.lt.s32.totalorder %s5227_s30, %s5227_s30 }
 0x2c4   :  { %5797 = vmatprep.subr.bf16.mxu0 %v5943_v46  ;;  %v4222_v15 = vcombine.low %v4214_v3, %v4221_v8  ;;  %v4342_v62 = vcombine.low %v4333_v10, %v4340_v52  ;;  %v4229_v40 = vrot.slane %v5478_v9, %v6116_v28  ;;  %v4364_v48 = vrot.slane %v7284_v4, %v6116_v28 }
 0x2c5   :  { %v4349_v7 = vrot.slane %v4341_v32, %v6116_v28  ;;  %v3967_v58 = vrot.slane %v3960_v26, %v6116_v28  ;;  %v4102_v56 = vrot.slane %v4095_v60, %v6116_v28 }
 0x2c6   :  { %v4356_v20 = vrot.slane %v4342_v62, %v6116_v28  ;;  %v4236_v47 = vrot.slane %v4229_v40, %v6116_v28  ;;  %v4371_v57 = vrot.slane %v4364_v48, %v6116_v28 }
 0x2c8   :  { %v4357_v1 = vcombine.low %v4349_v7, %v4356_v20 }
 0x2ca   :  { %5794 = vmatmul.mubr.msk.bf16.vlgmr.msra.gmra.mrb[44].mxu0 %vm857_vm3, %v3831_v18 }
 0x2cb   :  { %5798 = vmatpush3.bf16.msra.mxu0 %v5943_v46  ;;  %5799 = vmatprep.mubr.msk.bf16.mxu0 %vm857_vm3, %v3953_v35 }
 0x2cc   :  { %5803 = vmatprep.subr.bf16.mxu0 %v5944_v49 }
 0x2d2   :  { %5800 = vmatmul.mubr.msk.bf16.vlgmr.msra.gmra.mrb[48].mxu0 %vm857_vm3, %v3967_v58 }
 0x2d3   :  { %5804 = vmatpush3.bf16.msra.mxu0 %v5944_v49  ;;  %5805 = vmatprep.mubr.msk.bf16.mxu0 %vm857_vm3, %v4088_v16 }
 0x2d4   :  { %5809 = vmatprep.subr.bf16.mxu0 %v5945_v13 }
 0x2da   :  { %5806 = vmatmul.mubr.msk.bf16.vlgmr.msra.gmra.mrb[52].mxu0 %vm857_vm3, %v4102_v56  ;;  %v5490_v56 = vld [vmem:[%s7678_s6] ss:$0 sm:$0xff] }
 0x2db   :  { %5810 = vmatpush3.bf16.msra.mxu0 %v5945_v13  ;;  %5811 = vmatprep.mubr.msk.bf16.mxu0 %vm857_vm3, %v4222_v15 }
 0x2dc   :  { %5815 = vmatprep.subr.bf16.mxu0 %v5946_v36 }
 0x2e2   :  { %5812 = vmatmul.mubr.msk.bf16.vlgmr.msra.gmra.mrb[56].mxu0 %vm857_vm3, %v4236_v47 }
 0x2e3   :  { %5816 = vmatpush3.bf16.msra.mxu0 %v5946_v36  ;;  %5817 = vmatprep.mubr.msk.bf16.mxu0 %vm857_vm3, %v4357_v1 }
 0x2e4   :  { %5821 = vmatprep.subr.bf16.mxu0 %v7883_v24 }
 0x2ea   :  { %5818 = vmatmul.mubr.msk.bf16.vlgmr.msra.gmra.mrb[60].mxu0 %vm857_vm3, %v4371_v57 }
 0x2eb   :  { %5823 = vmatprep.mubr.msk.bf16.mxu0 %vm5983_vm0, %v7883_v24  ;;  %5822 = vmatpush3.bf16.msra.mxu0 %v5947_v44 }
 0x2ec   :  { %5827 = vmatprep.subr.bf16.mxu0 %v7883_v24 }
 0x37d   :  { %v5771_v4 = vpop.f32.mrb[28].mxu0 }
 0x37e   :  { %v3341_v42 = vpop.f32.mrb[29].mxu0 }
 0x37f   :  { %v5772_v45 = vpop.f32.mrb[30].mxu0 }
 0x380   :  { %v3344_v59 = vpop.f32.mrb[31].mxu0 }
 0x385   :  { %v5777_v19 = vpop.f32.mrb[32].mxu0 }
 0x386   :  { %v3482_v35 = vadd.f32 %v5777_v19, %v5771_v4  ;;  %v3473_v51 = vpop.f32.mrb[33].mxu0 }
 0x387   :  { %v3474_v21 = vadd.f32 %v3473_v51, %v3341_v42  ;;  %v5778_v61 = vpop.f32.mrb[34].mxu0 }
 0x388   :  { %v3476_v14 = vpop.f32.mrb[35].mxu0 }
 0x389   :  { %v3477_v22 = vadd.f32 %v3476_v14, %v3344_v59 }
 0x38d   :  { %v5783_v30 = vpop.f32.mrb[36].mxu0 }
 0x38e   :  { %v3624_v17 = vadd.f32 %v5783_v30, %v3482_v35  ;;  %v3608_v11 = vpop.f32.mrb[37].mxu0 }
 0x38f   :  { %v3622_v31 = vadd.f32 %v3608_v11, %v3474_v21  ;;  %v5784_v63 = vpop.f32.mrb[38].mxu0 }
 0x390   :  { %v3611_v0 = vpop.f32.mrb[39].mxu0 }
 0x391   :  { %v3623_v38 = vadd.f32 %v3611_v0, %v3477_v22 }
 0x395   :  { %v5789_v5 = vpop.f32.mrb[40].mxu0 }
 0x396   :  { %v3760_v25 = vadd.f32 %v5789_v5, %v3624_v17  ;;  %v3744_v9 = vpop.f32.mrb[41].mxu0 }
 0x397   :  { %v3758_v54 = vadd.f32 %v3744_v9, %v3622_v31  ;;  %v5790_v41 = vpop.f32.mrb[42].mxu0 }
 0x398   :  { %v3747_v6 = vpop.f32.mrb[43].mxu0 }
 0x399   :  { %v3759_v37 = vadd.f32 %v3747_v6, %v3623_v38 }
 0x39d   :  { %v5795_v12 = vpop.f32.mrb[44].mxu0 }
 0x39e   :  { %v3894_v16 = vadd.f32 %v5795_v12, %v3760_v25  ;;  %v3878_v33 = vpop.f32.mrb[45].mxu0 }
 0x39f   :  { %v3892_v43 = vadd.f32 %v3878_v33, %v3758_v54  ;;  %v5796_v46 = vpop.f32.mrb[46].mxu0 }
 0x3a0   :  { %v3881_v34 = vpop.f32.mrb[47].mxu0 }
 0x3a1   :  { %v3893_v50 = vadd.f32 %v3881_v34, %v3759_v37 }
 0x3a5   :  { %v5801_v53 = vpop.f32.mrb[48].mxu0 }
 0x3a6   :  { %v4030_v39 = vadd.f32 %v5801_v53, %v3894_v16  ;;  %v4014_v3 = vpop.f32.mrb[49].mxu0 }
 0x3a7   :  { %v4028_v55 = vadd.f32 %v4014_v3, %v3892_v43  ;;  %v5802_v8 = vpop.f32.mrb[50].mxu0 }
 0x3a8   :  { %v4017_v23 = vpop.f32.mrb[51].mxu0 }
 0x3a9   :  { %v4029_v10 = vadd.f32 %v4017_v23, %v3893_v50 }
 0x3ad   :  { %v5807_v52 = vpop.f32.mrb[52].mxu0 }
 0x3ae   :  { %v4165_v27 = vadd.f32 %v5807_v52, %v4030_v39  ;;  %v4149_v15 = vpop.f32.mrb[53].mxu0  ;;  %v5949_v52 = vld [vmem:[%s7679_s7] sm:$0xff]  }
 0x3af   :  { %v4163_v32 = vadd.f32 %v4149_v15, %v4028_v55  ;;  %v5808_v62 = vpop.f32.mrb[54].mxu0 }
 0x3b0   :  { %v4152_v7 = vpop.f32.mrb[55].mxu0  ;;  %v5950_v62 = vld [vmem:[%s7679_s7 + $0x20] sm:$0xff]  }
 0x3b1   :  { %v4164_v20 = vadd.f32 %v4152_v7, %v4029_v10 }
 0x3b5   :  { %v5813_v18 = vpop.f32.mrb[56].mxu0 }
 0x3b6   :  { %v4299_v49 = vadd.f32 %v5813_v18, %v4165_v27  ;;  %v4283_v2 = vpop.f32.mrb[57].mxu0 }
 0x3b7   :  { %v4297_v1 = vadd.f32 %v4283_v2, %v4163_v32  ;;  %v5814_v26 = vpop.f32.mrb[58].mxu0  ;;  %v5951_v2 = vld [vmem:[%s7679_s7 + $0x18] sm:$0xff]  }
 0x3b8   :  { %v4286_v58 = vpop.f32.mrb[59].mxu0  ;;  %v5952_v26 = vld [vmem:[%s7679_s7 + $0x30] sm:$0xff]  }
 0x3b9   :  { %v4298_v13 = vadd.f32 %v4286_v58, %v4164_v20 }
 0x3bd   :  { %v5819_v60 = vpop.f32.mrb[60].mxu0 }
 0x3be   :  { %v4434_v36 = vadd.f32 %v5819_v60, %v4299_v49  ;;  %v4418_v40 = vpop.f32.mrb[61].mxu0 }
 0x3bf   :  { %v4432_v47 = vadd.f32 %v4418_v40, %v4297_v1  ;;  %v5820_v48 = vpop.f32.mrb[62].mxu0  ;;  %v5954_v40 = vld [vmem:[%s7679_s7 + $0x40] sm:$0xff]  }
 0x3c0   :  { %v4444_v57 = vadd.f32 %v5490_v56, %v4434_v36  ;;  %v4421_v44 = vpop.f32.mrb[63].mxu0 }
 0x3c1   :  { %v4442_v29 = vadd.f32 %v5490_v56, %v4432_v47  ;;  %v4433_v4 = vadd.f32 %v4421_v44, %v4298_v13  ;;  %v5955_v44 = vld [vmem:[%s7679_s7 + $0x38] sm:$0xff]  }
 0x3c2   :  { %v4447_v42 = vmax.f32 %v4444_v57, 0.0 }
 0x3c3   :  { %v4443_v45 = vadd.f32 %v5490_v56, %v4433_v4  ;;  %v4445_v19 = vmax.f32 %v4442_v29, 0.0  ;;  %v5953_v56 = vld [vmem:[%s7679_s7 + $0x28] sm:$0xff]  }
 0x3c4   :  { %v4449_v59 = vpack.c.bf16 %v4447_v42, %v4447_v42 }
 0x3c5   :  { %v4446_v35 = vmax.f32 %v4443_v45, 0.0 }
 0x3c6   :  { %v4507_v51 = vrot.slane %v4449_v59, %v6116_v28  ;;  %v5956_v59 = vld [vmem:[%s7681_s9] sm:$0xff]  }
 0x3c7   :  { %v4448_v21 = vpack.c.bf16 %v4446_v35, %v4445_v19  ;;  %v5491_v61 = vpack.c.bf16 %v4446_v35, %v4446_v35  ;;  %v5957_v19 = vld [vmem:[%s7681_s9 + $0x8] sm:$0xff]  }
 0x3c8   :  { %v4514_v14 = vrot.slane %v4507_v51, %v6116_v28 }
 0x3c9   :  { %v4459_v22 = vrot.slane %v4448_v21, %v6116_v28  ;;  %v4466_v30 = vrot.slane %v5491_v61, %v6116_v28 }
 0x3ca   :  { %v4532_v17 = vunpack.i.h.s16 %v4514_v14 }
 0x3cb   :  { %v4467_v11 = vcombine.high %v4459_v22, %v4459_v22  ;;  %v4468_v31 = vcombine.high %v4466_v30, %v4466_v30  ;;  %v4475_v63 = vrot.slane %v4459_v22, %v6116_v28  ;;  %v4482_v0 = vrot.slane %v4466_v30, %v6116_v28 }
 0x3cd   :  { %v4489_v38 = vrot.slane %v4467_v11, %v6116_v28  ;;  %v4496_v5 = vrot.slane %v4468_v31, %v6116_v28  ;;  %v4497_v25 = vcombine.high %v4475_v63, %v4475_v63  ;;  %v4498_v9 = vcombine.high %v4482_v0, %v4482_v0 }
 0x3ce   :  { %v4516_v54 = vunpack.i.h.s16 %v4475_v63  ;;  %v4524_v41 = vunpack.i.h.s16 %v4482_v0  ;;  %v7574_v6 = vpack.i.b16 %v4532_v17, %v4482_v0 }
 0x3cf   :  { %v4499_v37 = vcombine.high %v4489_v38, %v4489_v38  ;;  %v4500_v12 = vcombine.high %v4496_v5, %v4496_v5  ;;  %v4518_v16 = vunpack.i.h.s16 %v4489_v38  ;;  %v4520_v33 = vunpack.i.h.s16 %v4497_v25 }
 0x3d0   :  { %v4526_v43 = vunpack.i.h.s16 %v4496_v5  ;;  %v4528_v46 = vunpack.i.h.s16 %v4498_v9  ;;  %v5494_v34 = vpack.i.b16 %v4496_v5, %v4516_v54  ;;  %v5497_v50 = vpack.i.b16 %v4524_v41, %v4475_v63 }
 0x3d1   :  { %v4530_v53 = vunpack.i.h.s16 %v4500_v12  ;;  %v5507_v39 = vpack.i.b16 %v4498_v9, %v4518_v16  ;;  %v5517_v3 = vpack.i.b16 %v4500_v12, %v4520_v33  ;;  %v4522_v55 = vunpack.i.h.s16 %v4499_v37 }
 0x3d2   :  { %v5502_v8 = vpack.i.b16 %v4526_v43, %v4489_v38  ;;  %v5512_v23 = vpack.i.b16 %v4528_v46, %v4497_v25  ;;  %v4545_v10 = vrot.slane %v5494_v34, %v6116_v28  ;;  %v4609_v18 = vrot.slane %v5497_v50, %v6116_v28 }
 0x3d3   :  { %v5522_v27 = vpack.i.b16 %v4530_v53, %v4499_v37  ;;  %v5527_v20 = vpack.i.b16 %v4514_v14, %v4522_v55  ;;  %v4744_v13 = vrot.slane %v5507_v39, %v6116_v28  ;;  %v4880_v48 = vrot.slane %v5517_v3, %v6116_v28 }
 0x3d4   :  { %v4676_v15 = vrot.slane %v5502_v8, %v6116_v28  ;;  %v4552_v32 = vrot.slane %v4545_v10, %v6116_v28  ;;  %v4812_v49 = vrot.slane %v5512_v23, %v6116_v28  ;;  %v4616_v1 = vrot.slane %v4609_v18, %v6116_v28 }
 0x3d5   :  { %v4948_v60 = vrot.slane %v5522_v27, %v6116_v28  ;;  %v4751_v36 = vrot.slane %v4744_v13, %v6116_v28  ;;  %v5084_v57 = vrot.slane %v7574_v6, %v6116_v28  ;;  %v4887_v29 = vrot.slane %v4880_v48, %v6116_v28 }
 0x3d6   :  { %5824 = vmatmul.mubr.msk.bf16.vlgmr.msra.gmra.mrb[64].mxu0 %vm857_vm3, %v4552_v32  ;;  %v4683_v7 = vrot.slane %v4676_v15, %v6116_v28  ;;  %v4819_v58 = vrot.slane %v4812_v49, %v6116_v28  ;;  %v5016_v42 = vrot.slane %v5527_v20, %v6116_v28 }
 0x3d7   :  { %5828 = vmatpush3.bf16.msra.mxu0 %v5949_v52  ;;  %5829 = vmatprep.mubr.msk.bf16.mxu0 %vm5983_vm0, %v7883_v24  ;;  %v4955_v47 = vrot.slane %v4948_v60, %v6116_v28  ;;  %v5091_v4 = vrot.slane %v5084_v57, %v6116_v28 }
 0x3d8   :  { %5836 = vmatmul.mubr.msk.bf16.vlgmr.msra.gmra.mrb[40].mxu1 %vm857_vm3, %v4683_v7  ;;  %5839 = vmatprep.subr.bf16.mxu0 %v7883_v24  ;;  %v5023_v45 = vrot.slane %v5016_v42, %v6116_v28  ;;  %v5535_v7 = vld [vmem:[%s7680_s8] ss:$0 sm:$0xff]  ;;  %s5958_s8 = scalar_lea.vmem %s5227_s30, 32 }
 0x3d9   :  { %5846 = vmatpush3.bf16.msra.mxu1 %v5950_v62  ;;  %5847 = vmatprep.mubr.msk.bf16.mxu1 %vm5983_vm0, %v7883_v24  ;;  %p5959_p0 = scmp.ne.s32.totalorder %s5227_s30, %s5958_s8  ;;  %p5964_p2 = scmp.lt.s32.totalorder %s5958_s8, %s5958_s8 }
 0x3da   :  { %5857 = vmatprep.subr.bf16.mxu1 %v7883_v24 }
 0x3db   :  { %p5965_p3 = por %p5964_p2, %p5963_p1 }
 0x3dd   :  { %p5966_p4 = pnand %p5965_p3, %p5959_p0 }
 0x3de   :  { %5830 = vmatmul.mubr.msk.bf16.vlgmr.msra.gmra.mrb[68].mxu0 %vm857_vm3, %v4616_v1 }
 0x3df   :  { %5840 = vmatpush3.bf16.msra.mxu0 %v5951_v2  ;;  %5841 = vmatprep.mubr.msk.bf16.mxu0 %vm5983_vm0, %v7883_v24 }
 0x3e0   :  { %5848 = vmatmul.mubr.msk.bf16.vlgmr.msra.gmra.mrb[44].mxu1 %vm857_vm3, %v4819_v58  ;;  %5851 = vmatprep.subr.bf16.mxu0 %v7883_v24  ;;  %v5536_v58 = vld [vmem:[%s7682_s10] ss:$0 sm:$0xff] }
 0x3e1   :  { %5858 = vmatpush3.bf16.msra.mxu1 %v5952_v26  ;;  %5859 = vmatprep.mubr.msk.bf16.mxu1 %vm5983_vm0, %v7883_v24 }
 0x3e2   :  { %5869 = vmatprep.subr.bf16.mxu1 %v7883_v24 }
 0x3e6   :  { %5842 = vmatmul.mubr.msk.bf16.vlgmr.msra.gmra.mrb[72].mxu0 %vm857_vm3, %v4751_v36 }
 0x3e7   :  { %5852 = vmatpush3.bf16.msra.mxu0 %v5953_v56  ;;  %5853 = vmatprep.mubr.msk.bf16.mxu0 %vm5983_vm0, %v7883_v24 }
 0x3e8   :  { %5860 = vmatmul.mubr.msk.bf16.vlgmr.msra.gmra.mrb[48].mxu1 %vm857_vm3, %v4955_v47  ;;  %5863 = vmatprep.subr.bf16.mxu0 %v7883_v24 }
 0x3e9   :  { %5870 = vmatpush3.bf16.msra.mxu1 %v5954_v40  ;;  %5871 = vmatprep.mubr.msk.bf16.mxu1 %vm5983_vm0, %v7883_v24 }
 0x3ee   :  { %5854 = vmatmul.mubr.msk.bf16.vlgmr.msra.gmra.mrb[76].mxu0 %vm857_vm3, %v4887_v29 }
 0x3ef   :  { %5864 = vmatpush3.bf16.msra.mxu0 %v5955_v44  ;;  %5865 = vmatprep.mubr.msk.bf16.mxu0 %vm5983_vm0, %v7883_v24 }
 0x3f0   :  { %5872 = vmatmul.mubr.msk.bf16.vlgmr.msra.gmra.mrb[52].mxu1 %vm857_vm3, %v5091_v4  ;;  %5875 = vmatprep.subr.bf16.mxu0 %v7883_v24 }
 0x3f6   :  { %5866 = vmatmul.mubr.msk.bf16.vlgmr.msra.gmra.mrb[80].mxu0 %vm857_vm3, %v5023_v45 }
 0x3f7   :  { %5879 = vmatprep.mubr.msk.bf16.mxu0 %vm5983_vm0, %v7883_v24  ;;  %5876 = vmatpush3.bf16.msra.mxu0 %v5956_v59 }
 0x3f8   :  { %5877 = vmatprep.subr.bf16.mxu0 %v7883_v24 }
 0x3fb   :  { %5878 = vmatpush3.bf16.msra.mxu0 %v5957_v19 }
 0x4a9   :  { %v4596_v35 = vpop.f32.mrb[64].mxu0 }
 0x4aa   :  { %v5825_v51 = vpop.f32.mrb[65].mxu0 }
 0x4ab   :  { %v4599_v28 = vpop.f32.mrb[66].mxu0  ;;  %v4727_v21 = vpop.f32.mrb[40].mxu1 }
 0x4ac   :  { %v5826_v61 = vpop.f32.mrb[67].mxu0  ;;  %v5837_v14 = vpop.f32.mrb[41].mxu1 }
 0x4ad   :  { %v4730_v22 = vpop.f32.mrb[42].mxu1 }
 0x4ae   :  { %v5838_v30 = vpop.f32.mrb[43].mxu1 }
 0x4b1   :  { %v4660_v17 = vpop.f32.mrb[68].mxu0 }
 0x4b2   :  { %v4661_v11 = vadd.f32 %v4660_v17, %v4596_v35  ;;  %v5831_v31 = vpop.f32.mrb[69].mxu0 }
 0x4b3   :  { %v4663_v63 = vpop.f32.mrb[70].mxu0  ;;  %v4863_v0 = vpop.f32.mrb[44].mxu1 }
 0x4b4   :  { %v5832_v38 = vpop.f32.mrb[71].mxu0  ;;  %v5849_v5 = vpop.f32.mrb[45].mxu1  ;;  %v4733_v25 = vadd.f32 %v4727_v21, %v4661_v11 }
 0x4b5   :  { %v4866_v9 = vpop.f32.mrb[46].mxu1 }
 0x4b6   :  { %v5850_v54 = vpop.f32.mrb[47].mxu1 }
 0x4b9   :  { %v4795_v24 = vpop.f32.mrb[72].mxu0 }
 0x4ba   :  { %v4801_v41 = vadd.f32 %v4795_v24, %v4733_v25  ;;  %v5843_v6 = vpop.f32.mrb[73].mxu0 }
 0x4bb   :  { %v4798_v37 = vpop.f32.mrb[74].mxu0  ;;  %v4999_v12 = vpop.f32.mrb[48].mxu1 }
 0x4bc   :  { %v5844_v16 = vpop.f32.mrb[75].mxu0  ;;  %v5861_v33 = vpop.f32.mrb[49].mxu1  ;;  %v4869_v43 = vadd.f32 %v4863_v0, %v4801_v41 }
 0x4bd   :  { %v5002_v46 = vpop.f32.mrb[50].mxu1 }
 0x4be   :  { %v5862_v34 = vpop.f32.mrb[51].mxu1 }
 0x4c1   :  { %v4931_v50 = vpop.f32.mrb[76].mxu0 }
 0x4c2   :  { %v4937_v53 = vadd.f32 %v4931_v50, %v4869_v43  ;;  %v5855_v39 = vpop.f32.mrb[77].mxu0 }
 0x4c3   :  { %v4934_v3 = vpop.f32.mrb[78].mxu0  ;;  %v5135_v55 = vpop.f32.mrb[52].mxu1 }
 0x4c4   :  { %v5856_v8 = vpop.f32.mrb[79].mxu0  ;;  %v5873_v23 = vpop.f32.mrb[53].mxu1  ;;  %v5005_v10 = vadd.f32 %v4999_v12, %v4937_v53 }
 0x4c5   :  { %v5138_v52 = vpop.f32.mrb[54].mxu1 }
 0x4c6   :  { %v5874_v27 = vpop.f32.mrb[55].mxu1 }
 0x4c9   :  { %v5067_v15 = vpop.f32.mrb[80].mxu0 }
 0x4ca   :  { %v5073_v32 = vadd.f32 %v5067_v15, %v5005_v10  ;;  %v5867_v62 = vpop.f32.mrb[81].mxu0 }
 0x4cb   :  { %v5070_v20 = vpop.f32.mrb[82].mxu0 }
 0x4cc   :  { %v5141_v18 = vadd.f32 %v5135_v55, %v5073_v32  ;;  %v5868_v49 = vpop.f32.mrb[83].mxu0 }
 0x4ce   :  { %v5149_v2 = vadd.f32 %v5535_v7, %v5141_v18 }
 0x4d0   :  { %v5150_v1 = vmax.f32 %v5149_v2, 0.0 }
 0x4d2   :  { %v5151_v26 = vpack.c.bf16 %v5150_v1, %v5150_v1 }
 0x4d4   :  { %5880 = vmatmul.mubr.msk.bf16.vlgmr.msra.gmra.mrb[84].mxu0 %vm5175_vm4, %v5151_v26 }
 0x5a7   :  { %v5213_v13 = vpop.f32.mrb[84].mxu0 }
 0x5a8   :  { %v5214_v60 = vadd.f32 %v5536_v58, %v5213_v13  ;;  %v5881_v56 = vpop.f32.mrb[85].mxu0 }
 0x5a9   :  { %v5216_v36 = vpop.f32.mrb[86].mxu0 }
 0x5aa   :  { %5219 = vst [vmem:[#allocation2] sm:$0x3] %v5214_v60  ;;  %v5882_v40 = vpop.f32.mrb[87].mxu0 }
 0x5ab   :  { %5969 = shalt.err (!%p5966_p4)
}
 0x5ac   :  { %s5970_s10 = scalar_lea.hbm %s7683_s11, 32 }
 0x5ad   :  { %p5971_p5 = scmp.ne.s32.totalorder %s7683_s11, %s5970_s10  ;;  %p5974_p6 = scmp.lt.u32.totalorder %s5970_s10, %s7683_s11 }
 0x5af   :  { %p5976_p7 = pnand %p5974_p6, %p5971_p5 }
 0x5b1   :  { %5979 = shalt.err (!%p5976_p7)
}
 0x5b2   :  { %5229 = dma.vmem_to_hbm [thread:$0]  %s5227_s30, 32, %s7683_s11, [#allocation3]  }
 0x5b3   :  { %5980 = dma.done.wait [#allocation3], 32  }
 0x5b4   :  { %5981 = vsyncadd [#allocation3], 4294967264 }
 0x5b5   :  { %5233 = vsyncpa [#allocation3], 1 }

</bundles_post_ra>
